<compile_context>
chip_gen: v7x
topology: tpu7x:2x2x1
jax: 0.10.0
libtpu: 0.0.40
codegen_flags: <defaults>
</compile_context>

<pallas_src>
import functools
import math

import jax
import jax.numpy as jnp
from jax.experimental import pallas as pl
from jax.experimental.pallas import tpu as pltpu

_LANE = 128


def _round_up(n, m):
    return ((n + m - 1) // m) * m


def _pad_last(a, target):
    pad = target - a.shape[-1]
    if pad == 0:
        return a
    widths = [(0, 0)] * (a.ndim - 1) + [(0, pad)]
    return jnp.pad(a, widths)


def _pad2d(a, rows, cols):
    pr, pc = rows - a.shape[0], cols - a.shape[1]
    if pr == 0 and pc == 0:
        return a
    return jnp.pad(a, ((0, pr), (0, pc)))


def _nbytes(arr):
    return math.prod(arr.shape) * arr.dtype.itemsize


def _sage_fused_kernel(*refs, n_layers, num_dsts, assoc):
    """Fused n_layers SAGEConv('mean') forward for Bb sampled-block sets.

    refs layout (L = n_layers):
      refs[0:L]            A_l    (Bb, nd_l, ns_l)   bf16 (binary, unnormalized)
      refs[L:2L]           deg_l  (Bb, nd_l, 1)      f32
      refs[2L]             X      (Bb, ns_0, f0p)    bf16 (feature dim 128-padded)
      refs[2L+1:3L+1]      Wself_l (fin_p, fout_p)   bf16
      refs[3L+1:4L+1]      Wngh_l  (fin_p, fout_p)   bf16
      refs[4L+1:5L+1]      bias_l  (1, fout_p)       f32
      refs[5L+1]           out    (Bb, nd_{L-1}, Cp) f32
    """
    L = n_layers
    a_refs = refs[:L]
    deg_refs = refs[L:2 * L]
    x_ref = refs[2 * L]
    ws_refs = refs[2 * L + 1:3 * L + 1]
    wn_refs = refs[3 * L + 1:4 * L + 1]
    b_refs = refs[4 * L + 1:5 * L + 1]
    o_ref = refs[5 * L + 1]

    x = x_ref[...]                                    # (Bb, ns0, f0p) bf16
    bb = x.shape[0]
    for l in range(L):
        nd = num_dsts[l]
        ns = x.shape[1]
        a = a_refs[l][...]                            # (Bb, nd, ns) bf16 binary
        w_self = ws_refs[l][...]                      # (fin_p, fout_p) bf16
        w_neigh = wn_refs[l][...]
        # 1/deg on the EUP (approx reciprocal, separate VLIW slot); stays f32.
        inv_deg = pl.reciprocal(deg_refs[l][...], approx=True)   # (Bb, nd, 1)

        x_dst = x[:, :nd, :]                          # self features (DGL order)
        if assoc[l] == "AX_W":
            # mean(A @ X) @ W_neigh
            ax = jnp.einsum("bds,bsf->bdf", a, x,
                            preferred_element_type=jnp.float32)
            h_neigh = (ax * inv_deg).astype(jnp.bfloat16)
            neigh = jnp.dot(h_neigh.reshape(bb * nd, -1), w_neigh,
                            preferred_element_type=jnp.float32)
        else:
            # mean(A @ (X @ W_neigh))  -- cheaper when nd*fin > ns*fout-ish
            xw = jnp.dot(x.reshape(bb * ns, -1), w_neigh,
                         preferred_element_type=jnp.float32)
            xw = xw.reshape(bb, ns, -1).astype(jnp.bfloat16)
            axw = jnp.einsum("bds,bsf->bdf", a, xw,
                             preferred_element_type=jnp.float32)
            neigh = (axw * inv_deg).reshape(bb * nd, -1)

        own = jnp.dot(x_dst.reshape(bb * nd, -1), w_self,
                      preferred_element_type=jnp.float32)
        out = own + neigh + b_refs[l][...]            # (Bb*nd, fout_p) f32
        if l != L - 1:
            x = jnp.maximum(out, 0.0).astype(jnp.bfloat16).reshape(bb, nd, -1)
        else:
            # single lane-dense (128-wide) HBM store of the whole fused stack
            o_ref[...] = out.reshape(bb, nd, -1).astype(o_ref.dtype)


def sage_forward(adjs, x, params, *, block_batch=None):
    """Full SAGE.forward for a batch of B independent sampled-block sets.

    adjs   : list of (B, num_dst_l, num_src_l) adjacencies (any nonzero = edge)
    x      : (B, num_src_0, in_feats) f32 source-node features
    params : list of (w_self (in,out), w_neigh (in,out), bias (out,))
    returns: (B, num_dst_{L-1}, n_classes) f32
    """
    n_layers = len(params)
    B, num_src0, in_feats = x.shape
    num_dsts = tuple(int(a.shape[1]) for a in adjs)
    num_srcs = tuple(int(a.shape[2]) for a in adjs)
    assert len(adjs) == n_layers
    assert num_srcs[0] == num_src0
    for l in range(1, n_layers):
        # DGL block convention: dst nodes of layer l-1 are the src nodes of l.
        assert num_srcs[l] == num_dsts[l - 1]

    # Batch Bb block-sets per grid step; keep the grid even for v7x megacore.
    if block_batch is None:
        block_batch = B // 2 if (B % 2 == 0 and B >= 2) else B
    assert B % block_batch == 0
    grid_b = B // block_batch

    # 128-pad every feature dim (in_feats, hiddens, n_classes).
    dims = [in_feats] + [p[0].shape[1] for p in params]
    pdims = [_round_up(d, _LANE) for d in dims]
    n_classes = dims[-1]

    # Binary bf16 adjacency (exact) + f32 degree; normalization done in-kernel.
    a_bin = [(a != 0).astype(jnp.bfloat16) for a in adjs]
    degs = [jnp.maximum(jnp.sum((a != 0).astype(jnp.float32), axis=-1,
                                keepdims=True), 1.0) for a in adjs]
    x_p = _pad_last(x, pdims[0]).astype(jnp.bfloat16)
    w_selfs = [_pad2d(w_s, pdims[l], pdims[l + 1]).astype(jnp.bfloat16)
               for l, (w_s, _, _) in enumerate(params)]
    w_neighs = [_pad2d(w_n, pdims[l], pdims[l + 1]).astype(jnp.bfloat16)
                for l, (_, w_n, _) in enumerate(params)]
    biases = [_pad_last(b.reshape(1, -1), pdims[l + 1]).astype(jnp.float32)
              for l, (_, _, b) in enumerate(params)]

    # Static per-layer matmul association choice (mean agg is linear -> exact).
    assoc = []
    for l in range(n_layers):
        nd, ns, fin, fout = num_dsts[l], num_srcs[l], pdims[l], pdims[l + 1]
        cost_ax_w = nd * ns * fin + nd * fin * fout
        cost_a_xw = ns * fin * fout + nd * ns * fout
        assoc.append("AX_W" if cost_ax_w <= cost_a_xw else "A_XW")
    assoc = tuple(assoc)

    out_shape = jax.ShapeDtypeStruct((B, num_dsts[-1], pdims[-1]), jnp.float32)

    in_specs = []
    for l in range(n_layers):
        in_specs.append(pl.BlockSpec((block_batch, num_dsts[l], num_srcs[l]),
                                     lambda b: (b, 0, 0)))
    for l in range(n_layers):
        in_specs.append(pl.BlockSpec((block_batch, num_dsts[l], 1),
                                     lambda b: (b, 0, 0)))
    in_specs.append(pl.BlockSpec((block_batch, num_src0, pdims[0]),
                                 lambda b: (b, 0, 0)))
    for arr_group in (w_selfs, w_neighs, biases):
        for arr in arr_group:
            in_specs.append(pl.BlockSpec(arr.shape, lambda b: (0, 0)))
    out_spec = pl.BlockSpec((block_batch, num_dsts[-1], pdims[-1]),
                            lambda b: (b, 0, 0))

    # Advisory cost estimate (lets XLA overlap the wrapper casts with the kernel).
    flops = 0
    for l in range(n_layers):
        nd, ns, fin, fout = num_dsts[l], num_srcs[l], pdims[l], pdims[l + 1]
        agg = (nd * ns * fin + nd * fin * fout) if assoc[l] == "AX_W" \
            else (ns * fin * fout + nd * ns * fout)
        flops += 2 * B * (agg + nd * fin * fout)
    bytes_accessed = (sum(_nbytes(a) for a in a_bin)
                      + sum(_nbytes(d) for d in degs)
                      + _nbytes(x_p)
                      + sum(_nbytes(w) for w in w_selfs + w_neighs + biases)
                      + _nbytes(out_shape))
    cost = pl.CostEstimate(flops=flops,
                           transcendentals=B * sum(num_dsts),
                           bytes_accessed=bytes_accessed)

    kernel = functools.partial(_sage_fused_kernel, n_layers=n_layers,
                               num_dsts=num_dsts, assoc=assoc)

    out_padded = pl.pallas_call(
        kernel,
        out_shape=out_shape,
        grid=(grid_b,),
        in_specs=in_specs,
        out_specs=out_spec,
        cost_estimate=cost,
        compiler_params=pltpu.CompilerParams(
            dimension_semantics=("parallel",)),
    )(*a_bin, *degs, x_p, *w_selfs, *w_neighs, *biases)

    # Strip the lane padding of n_classes.
    return out_padded[:, :, :n_classes]


def _sage_reference(adjs, x, params):
    """Pure-f32 JAX reference of the stacked SAGEConv('mean') forward."""
    n_layers = len(params)
    h = x.astype(jnp.float32)
    out = None
    for l, (adj, (w_self, w_neigh, b)) in enumerate(zip(adjs, params)):
        nd = adj.shape[1]
        a_bin = (adj != 0).astype(jnp.float32)
        deg = jnp.maximum(jnp.sum(a_bin, axis=-1, keepdims=True), 1.0)
        h_neigh = jnp.einsum("bds,bsf->bdf", a_bin / deg, h)
        out = (jnp.einsum("bdf,fo->bdo", h[:, :nd, :], w_self)
               + jnp.einsum("bdf,fo->bdo", h_neigh, w_neigh)
               + b.reshape(1, 1, -1))
        if l != n_layers - 1:
            h = jnp.maximum(out, 0.0)
    return out


def _make_bipartite(key, batch, num_dst, num_src):
    """Deterministic synthetic bipartite graph -> UNNORMALIZED 0/1 adjacency."""
    adj = jax.random.bernoulli(
        key, p=0.3, shape=(batch, num_dst, num_src)).astype(jnp.float32)
    # Guarantee each dst node has at least one neighbor (its own src copy),
    # mirroring self-inclusion in sampled DGL blocks.
    eye = jnp.eye(num_dst, num_src, dtype=jnp.float32)[None]
    return jnp.maximum(adj, eye)


def _init_sage_params(key, in_feats, n_hidden, n_classes, n_layers):
    dims = [in_feats] + [n_hidden] * (n_layers - 1) + [n_classes]
    params = []
    for l in range(n_layers):
        fin, fout = dims[l], dims[l + 1]
        key, k1, k2 = jax.random.split(key, 3)
        scale = 1.0 / jnp.sqrt(jnp.float32(fin))
        w_self = jax.random.normal(k1, (fin, fout), jnp.float32) * scale
        w_neigh = jax.random.normal(k2, (fin, fout), jnp.float32) * scale
        bias = jnp.zeros((fout,), jnp.float32)
        params.append((w_self, w_neigh, bias))
    return params


if __name__ == "__main__":
    # Small, SAGE-consistent shapes.
    in_feats, n_hidden, n_classes, n_layers = 16, 32, 8, 3
    # Node counts per sampled "block": src of layer l == dst of layer l-1.
    node_counts = [64, 32, 16, 8]
    B = 4                              # batch of independent sampled-block sets

    key = jax.random.PRNGKey(0)
    key, kx = jax.random.split(key)
    x = jax.random.normal(kx, (B, node_counts[0], in_feats), jnp.float32)

    adjs = []
    for l in range(n_layers):
        key, ka = jax.random.split(key)
        adjs.append(_make_bipartite(ka, B, node_counts[l + 1], node_counts[l]))

    key, kp = jax.random.split(key)
    params = _init_sage_params(kp, in_feats, n_hidden, n_classes, n_layers)

    out = sage_forward(adjs, x, params)
    out = jax.block_until_ready(out)
    assert out.shape == (B, node_counts[-1], n_classes)

    ref = _sage_reference(adjs, x, params)
    scale = float(jnp.max(jnp.abs(ref)))
    max_err = float(jnp.max(jnp.abs(out - ref)))
    # bf16 MXU operands vs pure-f32 reference: allow ~5% of the output scale.
    assert max_err <= 5e-2 * max(scale, 1.0), (max_err, scale)

    print("KERNEL_OK")
</pallas_src>

<mosaic_0001>
module attributes {stable_mosaic.version = 11 : i64} {
  func.func @_sage_fused_kernel(%arg0: i32, %arg1: memref<2x32x64xbf16, #tpu.memory_space<vmem>>, %arg2: memref<2x16x32xbf16, #tpu.memory_space<vmem>>, %arg3: memref<2x8x16xbf16, #tpu.memory_space<vmem>>, %arg4: memref<2x32x1xf32, #tpu.memory_space<vmem>>, %arg5: memref<2x16x1xf32, #tpu.memory_space<vmem>>, %arg6: memref<2x8x1xf32, #tpu.memory_space<vmem>>, %arg7: memref<2x64x128xbf16, #tpu.memory_space<vmem>>, %arg8: memref<128x128xbf16, #tpu.memory_space<vmem>>, %arg9: memref<128x128xbf16, #tpu.memory_space<vmem>>, %arg10: memref<128x128xbf16, #tpu.memory_space<vmem>>, %arg11: memref<128x128xbf16, #tpu.memory_space<vmem>>, %arg12: memref<128x128xbf16, #tpu.memory_space<vmem>>, %arg13: memref<128x128xbf16, #tpu.memory_space<vmem>>, %arg14: memref<1x128xf32, #tpu.memory_space<vmem>>, %arg15: memref<1x128xf32, #tpu.memory_space<vmem>>, %arg16: memref<1x128xf32, #tpu.memory_space<vmem>>, %arg17: memref<2x8x128xf32, #tpu.memory_space<vmem>>) attributes {dimension_semantics = [#tpu.dimension_semantics<parallel>], iteration_bounds = array<i64: 2>, scalar_prefetch = 0 : i64, scratch_operands = 0 : i64, tpu.core_type = #tpu.core_type<tc>, window_params = [{transform_indices = @transform_0, window_bounds = array<i64: 2, 32, 64>}, {transform_indices = @transform_1, window_bounds = array<i64: 2, 16, 32>}, {transform_indices = @transform_2, window_bounds = array<i64: 2, 8, 16>}, {transform_indices = @transform_3, window_bounds = array<i64: 2, 32, 1>}, {transform_indices = @transform_4, window_bounds = array<i64: 2, 16, 1>}, {transform_indices = @transform_5, window_bounds = array<i64: 2, 8, 1>}, {transform_indices = @transform_6, window_bounds = array<i64: 2, 64, 128>}, {pipeline_mode = #tpu.pipeline_mode<synchronous>, transform_indices = @transform_7, window_bounds = array<i64: 128, 128>}, {pipeline_mode = #tpu.pipeline_mode<synchronous>, transform_indices = @transform_8, window_bounds = array<i64: 128, 128>}, {pipeline_mode = #tpu.pipeline_mode<synchronous>, transform_indices = @transform_9, window_bounds = array<i64: 128, 128>}, {pipeline_mode = #tpu.pipeline_mode<synchronous>, transform_indices = @transform_10, window_bounds = array<i64: 128, 128>}, {pipeline_mode = #tpu.pipeline_mode<synchronous>, transform_indices = @transform_11, window_bounds = array<i64: 128, 128>}, {pipeline_mode = #tpu.pipeline_mode<synchronous>, transform_indices = @transform_12, window_bounds = array<i64: 128, 128>}, {pipeline_mode = #tpu.pipeline_mode<synchronous>, transform_indices = @transform_13, window_bounds = array<i64: 1, 128>}, {pipeline_mode = #tpu.pipeline_mode<synchronous>, transform_indices = @transform_14, window_bounds = array<i64: 1, 128>}, {pipeline_mode = #tpu.pipeline_mode<synchronous>, transform_indices = @transform_15, window_bounds = array<i64: 1, 128>}, {transform_indices = @transform_16, window_bounds = array<i64: 2, 8, 128>}]} {
    %c0 = arith.constant 0 : index
    %c0_0 = arith.constant 0 : index
    %c0_1 = arith.constant 0 : index
    %0 = vector.load %arg7[%c0, %c0_0, %c0_1] : memref<2x64x128xbf16, #tpu.memory_space<vmem>>, vector<2x64x128xbf16>
    %c0_2 = arith.constant 0 : index
    %c0_3 = arith.constant 0 : index
    %c0_4 = arith.constant 0 : index
    %1 = vector.load %arg1[%c0_2, %c0_3, %c0_4] : memref<2x32x64xbf16, #tpu.memory_space<vmem>>, vector<2x32x64xbf16>
    %c0_5 = arith.constant 0 : index
    %c0_6 = arith.constant 0 : index
    %2 = vector.load %arg8[%c0_5, %c0_6] : memref<128x128xbf16, #tpu.memory_space<vmem>>, vector<128x128xbf16>
    %c0_7 = arith.constant 0 : index
    %c0_8 = arith.constant 0 : index
    %3 = vector.load %arg11[%c0_7, %c0_8] : memref<128x128xbf16, #tpu.memory_space<vmem>>, vector<128x128xbf16>
    %c0_9 = arith.constant 0 : index
    %c0_10 = arith.constant 0 : index
    %c0_11 = arith.constant 0 : index
    %4 = vector.load %arg4[%c0_9, %c0_10, %c0_11] : memref<2x32x1xf32, #tpu.memory_space<vmem>>, vector<2x32x1xf32>
    %5 = tpu.reciprocal %4 {approx = true} : vector<2x32x1xf32> -> vector<2x32x1xf32>
    %6 = vector.extract_strided_slice %0 {offsets = [0, 0, 0], sizes = [2, 32, 128], strides = [1, 1, 1]} : vector<2x64x128xbf16> to vector<2x32x128xbf16>
    "tpu.trace_start"() <{level = 10 : i32, message = "bds,bsf->bdf"}> : () -> ()
    %cst = arith.constant dense<0.000000e+00> : vector<2x32x128xf32>
    %7 = tpu.matmul %1, %0, %cst {dimension_numbers = #tpu.dot_dimension_numbers<[2], [1], [1], [2], [0, 0, 0, 1, 1, 2], [0], [0]>} : vector<2x32x64xbf16>, vector<2x64x128xbf16>, vector<2x32x128xf32> -> vector<2x32x128xf32>
    "tpu.trace_stop"() : () -> ()
    %8 = vector.broadcast %5 : vector<2x32x1xf32> to vector<2x32x128xf32>
    %9 = arith.mulf %7, %8 : vector<2x32x128xf32>
    %10 = arith.truncf %9 : vector<2x32x128xf32> to vector<2x32x128xbf16>
    %11 = vector.shape_cast %10 : vector<2x32x128xbf16> to vector<64x128xbf16>
    %cst_12 = arith.constant dense<0.000000e+00> : vector<64x128xf32>
    %12 = tpu.matmul %11, %3, %cst_12 {dimension_numbers = #tpu.dot_dimension_numbers<[1], [0], [0], [1], [0, 0, 1, 1], [], []>} : vector<64x128xbf16>, vector<128x128xbf16>, vector<64x128xf32> -> vector<64x128xf32>
    %13 = vector.shape_cast %6 : vector<2x32x128xbf16> to vector<64x128xbf16>
    %cst_13 = arith.constant dense<0.000000e+00> : vector<64x128xf32>
    %14 = tpu.matmul %13, %2, %cst_13 {dimension_numbers = #tpu.dot_dimension_numbers<[1], [0], [0], [1], [0, 0, 1, 1], [], []>} : vector<64x128xbf16>, vector<128x128xbf16>, vector<64x128xf32> -> vector<64x128xf32>
    %15 = arith.addf %14, %12 : vector<64x128xf32>
    %c0_14 = arith.constant 0 : index
    %c0_15 = arith.constant 0 : index
    %16 = vector.load %arg14[%c0_14, %c0_15] : memref<1x128xf32, #tpu.memory_space<vmem>>, vector<1x128xf32>
    %17 = vector.broadcast %16 : vector<1x128xf32> to vector<64x128xf32>
    %18 = arith.addf %15, %17 : vector<64x128xf32>
    %cst_16 = arith.constant 0.000000e+00 : f32
    %19 = vector.broadcast %cst_16 : f32 to vector<64x128xf32>
    %20 = arith.maximumf %18, %19 : vector<64x128xf32>
    %21 = arith.truncf %20 : vector<64x128xf32> to vector<64x128xbf16>
    %22 = vector.shape_cast %21 : vector<64x128xbf16> to vector<2x32x128xbf16>
    %c0_17 = arith.constant 0 : index
    %c0_18 = arith.constant 0 : index
    %c0_19 = arith.constant 0 : index
    %23 = vector.load %arg2[%c0_17, %c0_18, %c0_19] : memref<2x16x32xbf16, #tpu.memory_space<vmem>>, vector<2x16x32xbf16>
    %c0_20 = arith.constant 0 : index
    %c0_21 = arith.constant 0 : index
    %24 = vector.load %arg9[%c0_20, %c0_21] : memref<128x128xbf16, #tpu.memory_space<vmem>>, vector<128x128xbf16>
    %c0_22 = arith.constant 0 : index
    %c0_23 = arith.constant 0 : index
    %25 = vector.load %arg12[%c0_22, %c0_23] : memref<128x128xbf16, #tpu.memory_space<vmem>>, vector<128x128xbf16>
    %c0_24 = arith.constant 0 : index
    %c0_25 = arith.constant 0 : index
    %c0_26 = arith.constant 0 : index
    %26 = vector.load %arg5[%c0_24, %c0_25, %c0_26] : memref<2x16x1xf32, #tpu.memory_space<vmem>>, vector<2x16x1xf32>
    %27 = tpu.reciprocal %26 {approx = true} : vector<2x16x1xf32> -> vector<2x16x1xf32>
    %28 = vector.extract_strided_slice %22 {offsets = [0, 0, 0], sizes = [2, 16, 128], strides = [1, 1, 1]} : vector<2x32x128xbf16> to vector<2x16x128xbf16>
    "tpu.trace_start"() <{level = 10 : i32, message = "bds,bsf->bdf"}> : () -> ()
    %cst_27 = arith.constant dense<0.000000e+00> : vector<2x16x128xf32>
    %29 = tpu.matmul %23, %22, %cst_27 {dimension_numbers = #tpu.dot_dimension_numbers<[2], [1], [1], [2], [0, 0, 0, 1, 1, 2], [0], [0]>} : vector<2x16x32xbf16>, vector<2x32x128xbf16>, vector<2x16x128xf32> -> vector<2x16x128xf32>
    "tpu.trace_stop"() : () -> ()
    %30 = vector.broadcast %27 : vector<2x16x1xf32> to vector<2x16x128xf32>
    %31 = arith.mulf %29, %30 : vector<2x16x128xf32>
    %32 = arith.truncf %31 : vector<2x16x128xf32> to vector<2x16x128xbf16>
    %33 = vector.shape_cast %32 : vector<2x16x128xbf16> to vector<32x128xbf16>
    %cst_28 = arith.constant dense<0.000000e+00> : vector<32x128xf32>
    %34 = tpu.matmul %33, %25, %cst_28 {dimension_numbers = #tpu.dot_dimension_numbers<[1], [0], [0], [1], [0, 0, 1, 1], [], []>} : vector<32x128xbf16>, vector<128x128xbf16>, vector<32x128xf32> -> vector<32x128xf32>
    %35 = vector.shape_cast %28 : vector<2x16x128xbf16> to vector<32x128xbf16>
    %cst_29 = arith.constant dense<0.000000e+00> : vector<32x128xf32>
    %36 = tpu.matmul %35, %24, %cst_29 {dimension_numbers = #tpu.dot_dimension_numbers<[1], [0], [0], [1], [0, 0, 1, 1], [], []>} : vector<32x128xbf16>, vector<128x128xbf16>, vector<32x128xf32> -> vector<32x128xf32>
    %37 = arith.addf %36, %34 : vector<32x128xf32>
    %c0_30 = arith.constant 0 : index
    %c0_31 = arith.constant 0 : index
    %38 = vector.load %arg15[%c0_30, %c0_31] : memref<1x128xf32, #tpu.memory_space<vmem>>, vector<1x128xf32>
    %39 = vector.broadcast %38 : vector<1x128xf32> to vector<32x128xf32>
    %40 = arith.addf %37, %39 : vector<32x128xf32>
    %cst_32 = arith.constant 0.000000e+00 : f32
    %41 = vector.broadcast %cst_32 : f32 to vector<32x128xf32>
    %42 = arith.maximumf %40, %41 : vector<32x128xf32>
    %43 = arith.truncf %42 : vector<32x128xf32> to vector<32x128xbf16>
    %44 = vector.shape_cast %43 : vector<32x128xbf16> to vector<2x16x128xbf16>
    %c0_33 = arith.constant 0 : index
    %c0_34 = arith.constant 0 : index
    %c0_35 = arith.constant 0 : index
    %45 = vector.load %arg3[%c0_33, %c0_34, %c0_35] : memref<2x8x16xbf16, #tpu.memory_space<vmem>>, vector<2x8x16xbf16>
    %c0_36 = arith.constant 0 : index
    %c0_37 = arith.constant 0 : index
    %46 = vector.load %arg10[%c0_36, %c0_37] : memref<128x128xbf16, #tpu.memory_space<vmem>>, vector<128x128xbf16>
    %c0_38 = arith.constant 0 : index
    %c0_39 = arith.constant 0 : index
    %47 = vector.load %arg13[%c0_38, %c0_39] : memref<128x128xbf16, #tpu.memory_space<vmem>>, vector<128x128xbf16>
    %c0_40 = arith.constant 0 : index
    %c0_41 = arith.constant 0 : index
    %c0_42 = arith.constant 0 : index
    %48 = vector.load %arg6[%c0_40, %c0_41, %c0_42] : memref<2x8x1xf32, #tpu.memory_space<vmem>>, vector<2x8x1xf32>
    %49 = tpu.reciprocal %48 {approx = true} : vector<2x8x1xf32> -> vector<2x8x1xf32>
    %50 = vector.extract_strided_slice %44 {offsets = [0, 0, 0], sizes = [2, 8, 128], strides = [1, 1, 1]} : vector<2x16x128xbf16> to vector<2x8x128xbf16>
    "tpu.trace_start"() <{level = 10 : i32, message = "bds,bsf->bdf"}> : () -> ()
    %cst_43 = arith.constant dense<0.000000e+00> : vector<2x8x128xf32>
    %51 = tpu.matmul %45, %44, %cst_43 {dimension_numbers = #tpu.dot_dimension_numbers<[2], [1], [1], [2], [0, 0, 0, 1, 1, 2], [0], [0]>} : vector<2x8x16xbf16>, vector<2x16x128xbf16>, vector<2x8x128xf32> -> vector<2x8x128xf32>
    "tpu.trace_stop"() : () -> ()
    %52 = vector.broadcast %49 : vector<2x8x1xf32> to vector<2x8x128xf32>
    %53 = arith.mulf %51, %52 : vector<2x8x128xf32>
    %54 = arith.truncf %53 : vector<2x8x128xf32> to vector<2x8x128xbf16>
    %55 = vector.shape_cast %54 : vector<2x8x128xbf16> to vector<16x128xbf16>
    %cst_44 = arith.constant dense<0.000000e+00> : vector<16x128xf32>
    %56 = tpu.matmul %55, %47, %cst_44 {dimension_numbers = #tpu.dot_dimension_numbers<[1], [0], [0], [1], [0, 0, 1, 1], [], []>} : vector<16x128xbf16>, vector<128x128xbf16>, vector<16x128xf32> -> vector<16x128xf32>
    %57 = vector.shape_cast %50 : vector<2x8x128xbf16> to vector<16x128xbf16>
    %cst_45 = arith.constant dense<0.000000e+00> : vector<16x128xf32>
    %58 = tpu.matmul %57, %46, %cst_45 {dimension_numbers = #tpu.dot_dimension_numbers<[1], [0], [0], [1], [0, 0, 1, 1], [], []>} : vector<16x128xbf16>, vector<128x128xbf16>, vector<16x128xf32> -> vector<16x128xf32>
    %59 = arith.addf %58, %56 : vector<16x128xf32>
    %c0_46 = arith.constant 0 : index
    %c0_47 = arith.constant 0 : index
    %60 = vector.load %arg16[%c0_46, %c0_47] : memref<1x128xf32, #tpu.memory_space<vmem>>, vector<1x128xf32>
    %61 = vector.broadcast %60 : vector<1x128xf32> to vector<16x128xf32>
    %62 = arith.addf %59, %61 : vector<16x128xf32>
    %63 = vector.shape_cast %62 : vector<16x128xf32> to vector<2x8x128xf32>
    %c0_48 = arith.constant 0 : index
    %c0_49 = arith.constant 0 : index
    %c0_50 = arith.constant 0 : index
    %64 = vector.load %arg17[%c0_48, %c0_49, %c0_50] : memref<2x8x128xf32, #tpu.memory_space<vmem>>, vector<2x8x128xf32>
    tpu.vector_store %arg17[%c0_48, %c0_49, %c0_50], %63 {strides = array<i32>} : memref<2x8x128xf32, #tpu.memory_space<vmem>>, vector<2x8x128xf32>,
    return
  }
  func.func @transform_0(%arg0: i32) -> (i32, i32, i32) {
    %c0_i32 = arith.constant 0 : i32
    %c0_i32_0 = arith.constant 0 : i32
    %c0_i32_1 = arith.constant 0 : i32
    return %arg0, %c0_i32, %c0_i32_0 : i32, i32, i32
  }
  func.func @transform_1(%arg0: i32) -> (i32, i32, i32) {
    %c0_i32 = arith.constant 0 : i32
    %c0_i32_0 = arith.constant 0 : i32
    %c0_i32_1 = arith.constant 0 : i32
    return %arg0, %c0_i32, %c0_i32_0 : i32, i32, i32
  }
  func.func @transform_2(%arg0: i32) -> (i32, i32, i32) {
    %c0_i32 = arith.constant 0 : i32
    %c0_i32_0 = arith.constant 0 : i32
    %c0_i32_1 = arith.constant 0 : i32
    return %arg0, %c0_i32, %c0_i32_0 : i32, i32, i32
  }
  func.func @transform_3(%arg0: i32) -> (i32, i32, i32) {
    %c0_i32 = arith.constant 0 : i32
    %c0_i32_0 = arith.constant 0 : i32
    %c0_i32_1 = arith.constant 0 : i32
    return %arg0, %c0_i32, %c0_i32_0 : i32, i32, i32
  }
  func.func @transform_4(%arg0: i32) -> (i32, i32, i32) {
    %c0_i32 = arith.constant 0 : i32
    %c0_i32_0 = arith.constant 0 : i32
    %c0_i32_1 = arith.constant 0 : i32
    return %arg0, %c0_i32, %c0_i32_0 : i32, i32, i32
  }
  func.func @transform_5(%arg0: i32) -> (i32, i32, i32) {
    %c0_i32 = arith.constant 0 : i32
    %c0_i32_0 = arith.constant 0 : i32
    %c0_i32_1 = arith.constant 0 : i32
    return %arg0, %c0_i32, %c0_i32_0 : i32, i32, i32
  }
  func.func @transform_6(%arg0: i32) -> (i32, i32, i32) {
    %c0_i32 = arith.constant 0 : i32
    %c0_i32_0 = arith.constant 0 : i32
    %c0_i32_1 = arith.constant 0 : i32
    return %arg0, %c0_i32, %c0_i32_0 : i32, i32, i32
  }
  func.func @transform_7(%arg0: i32) -> (i32, i32) {
    %c0_i32 = arith.constant 0 : i32
    %c0_i32_0 = arith.constant 0 : i32
    %c0_i32_1 = arith.constant 0 : i32
    return %c0_i32, %c0_i32_0 : i32, i32
  }
  func.func @transform_8(%arg0: i32) -> (i32, i32) {
    %c0_i32 = arith.constant 0 : i32
    %c0_i32_0 = arith.constant 0 : i32
    %c0_i32_1 = arith.constant 0 : i32
    return %c0_i32, %c0_i32_0 : i32, i32
  }
  func.func @transform_9(%arg0: i32) -> (i32, i32) {
    %c0_i32 = arith.constant 0 : i32
    %c0_i32_0 = arith.constant 0 : i32
    %c0_i32_1 = arith.constant 0 : i32
    return %c0_i32, %c0_i32_0 : i32, i32
  }
  func.func @transform_10(%arg0: i32) -> (i32, i32) {
    %c0_i32 = arith.constant 0 : i32
    %c0_i32_0 = arith.constant 0 : i32
    %c0_i32_1 = arith.constant 0 : i32
    return %c0_i32, %c0_i32_0 : i32, i32
  }
  func.func @transform_11(%arg0: i32) -> (i32, i32) {
    %c0_i32 = arith.constant 0 : i32
    %c0_i32_0 = arith.constant 0 : i32
    %c0_i32_1 = arith.constant 0 : i32
    return %c0_i32, %c0_i32_0 : i32, i32
  }
  func.func @transform_12(%arg0: i32) -> (i32, i32) {
    %c0_i32 = arith.constant 0 : i32
    %c0_i32_0 = arith.constant 0 : i32
    %c0_i32_1 = arith.constant 0 : i32
    return %c0_i32, %c0_i32_0 : i32, i32
  }
  func.func @transform_13(%arg0: i32) -> (i32, i32) {
    %c0_i32 = arith.constant 0 : i32
    %c0_i32_0 = arith.constant 0 : i32
    %c0_i32_1 = arith.constant 0 : i32
    return %c0_i32, %c0_i32_0 : i32, i32
  }
  func.func @transform_14(%arg0: i32) -> (i32, i32) {
    %c0_i32 = arith.constant 0 : i32
    %c0_i32_0 = arith.constant 0 : i32
    %c0_i32_1 = arith.constant 0 : i32
    return %c0_i32, %c0_i32_0 : i32, i32
  }
  func.func @transform_15(%arg0: i32) -> (i32, i32) {
    %c0_i32 = arith.constant 0 : i32
    %c0_i32_0 = arith.constant 0 : i32
    %c0_i32_1 = arith.constant 0 : i32
    return %c0_i32, %c0_i32_0 : i32, i32
  }
  func.func @transform_16(%arg0: i32) -> (i32, i32, i32) {
    %c0_i32 = arith.constant 0 : i32
    %c0_i32_0 = arith.constant 0 : i32
    %c0_i32_1 = arith.constant 0 : i32
    return %arg0, %c0_i32, %c0_i32_0 : i32, i32, i32
  }
}

</mosaic_0001>

<bundles_post_ra>
// kernel: tpu_custom_call.1
= control target key start
LH: loop header
LB: loop body
LE: loop exit
PB: predicated region body
PF: predicated region fallthrough
CT: control target
= control target key end

     0   :  { %s3766_s0 = inlined_call_operand.vmem [shape: bf16[4,32,64], index: 0, kind: input, shape index: {}]   ;;  %s3767_s1 = inlined_call_operand.hbm [shape: bf16[4,16,32], index: 1, kind: input, shape index: {}]   ;;  %s3768_s2 = inlined_call_operand.hbm [shape: bf16[4,8,16], index: 2, kind: input, shape index: {}]   ;;  %s3769_s3 = inlined_call_operand.vmem [shape: f32[4,32,1], index: 3, kind: input, shape index: {}]   ;;  %s3770_s4 = inlined_call_operand.vmem [shape: f32[4,16,1], index: 4, kind: input, shape index: {}]   ;;  %s3771_s5 = inlined_call_operand.vmem [shape: f32[4,8,1], index: 5, kind: input, shape index: {}]   ;;  %s3772_s6 = inlined_call_operand.vmem [shape: bf16[4,64,128], index: 6, kind: input, shape index: {}]   ;;  %s3773_s7 = inlined_call_operand.vmem [shape: bf16[128,128], index: 7, kind: input, shape index: {}]   ;;  %s3774_s8 = inlined_call_operand.hbm [shape: bf16[128,128], index: 8, kind: input, shape index: {}]   ;;  %s3775_s9 = inlined_call_operand.hbm [shape: bf16[128,128], index: 9, kind: input, shape index: {}]   ;;  %s3776_s10 = inlined_call_operand.hbm [shape: bf16[128,128], index: 10, kind: input, shape index: {}]   ;;  %s3777_s11 = inlined_call_operand.hbm [shape: bf16[128,128], index: 11, kind: input, shape index: {}]   ;;  %s3778_s12 = inlined_call_operand.hbm [shape: bf16[128,128], index: 12, kind: input, shape index: {}]   ;;  %s3779_s13 = inlined_call_operand.vmem [shape: f32[1,128], index: 13, kind: input, shape index: {}]   ;;  %s3780_s14 = inlined_call_operand.vmem [shape: f32[1,128], index: 14, kind: input, shape index: {}]   ;;  %s3781_s15 = inlined_call_operand.vmem [shape: f32[1,128], index: 15, kind: input, shape index: {}]   ;;  %s3782_s16 = inlined_call_operand.hbm [shape: f32[4,8,128], index: 16, kind: output, shape index: {}]  }
   0x1   :  { %3792 = sst [smem:[#allocation21_spill]] %s3766_s0 }
   0x2   :  { %3793 = sst [smem:[#allocation22_spill]] %s3767_s1 }
   0x3   :  { %3794 = sst [smem:[#allocation23_spill]] %s3770_s4 }
   0x4   :  { %3795 = sst [smem:[#allocation24_spill]] %s3771_s5 }
   0x5   :  { %3796 = sst [smem:[#allocation25_spill]] %s3773_s7 }
   0x6   :  { %3797 = sst [smem:[#allocation26_spill]] %s3774_s8 }
   0x7   :  { %3798 = sst [smem:[#allocation27_spill]] %s3775_s9 }
   0x8   :  { %3799 = sst [smem:[#allocation28_spill]] %s3776_s10 }
   0x9   :  { %3800 = sst [smem:[#allocation29_spill]] %s3777_s11 }
   0xa   :  { %3801 = sst [smem:[#allocation30_spill]] %s3778_s12 }
   0xb   :  { %3802 = sst [smem:[#allocation31_spill]] %s3779_s13 }
   0xc   :  { %3803 = sst [smem:[#allocation32_spill]] %s3780_s14 }
   0xd   :  { %3804 = sst [smem:[#allocation33_spill]] %s3781_s15 }
   0xe   :  { %3805 = sst [smem:[#allocation34_spill]] %s3782_s16 }
   0xf   :  { %21 = vsyncpa [#allocation3], 0 }
  0x10   :  { %23 = vsyncpa [#allocation3 + $0x1], 0 }
  0x11   :  { %24 = vsyncpa [#allocation6], 0 }
  0x12   :  { %26 = vsyncpa [#allocation6 + $0x1], 0 }
  0x13   :  { %27 = vsyncpa [#allocation9], 0 }
  0x14   :  { %28 = vsyncpa [#allocation12], 0 }
  0x15   :  { %29 = vsyncpa [#allocation4], 0 }
  0x16   :  { %31 = vsyncpa [#allocation4 + $0x1], 0  ;;  %s3261_s21 = smov 0   ;;  %s3263_s22 = smov 0  }
  0x17   :  { %s3265_s23 = smov 0   ;;  %s3267_s24 = smov 0  }
  0x18 LB: > { %s3161_s25 = smov [#allocation7]   ;;  %s3282_s27 = sadd.s32 4294967295, %s3159_s24   ;;  %s3159_s24 = sphi %s3267_s24, %s3844_s24   ;;  %s3155_s23 = sphi %s3265_s23, %s3843_s23   ;;  %s3151_s22 = sphi %s3263_s22, %s3842_s22   ;;  %s3147_s21 = sphi %s3261_s21, %s3841_s21  }
  0x19   : > { %s454_s26 = sshll.u32 %s3161_s25, 4  ;;  %p2273_p0 = scmp.ge.s32.totalorder %s3159_s24, 1  ;;  %s3287_s26 = int_to_ptr.vmem [resolvable:$true] %s454_s26 }
  0x1a   : > { %p3785_p1 = scmp.eq.s32.totalorder %s3282_s27, 0  ;;  %p439_p2 = scmp.lt.s32.totalorder %s3159_s24, 3 }
  0x1b   : > { %s3162_s29 = smov [#allocation8]   ;;  %s3163_s17 = smov [#allocation11]  }
  0x1c   : > { %p3289_p3 = pnand %p2273_p0, %p439_p2  ;;  %s467_s30 = sshll.u32 %s3162_s29, 4  ;;  %s3302_s30 = int_to_ptr.vmem [resolvable:$true] %s467_s30 }
  0x1d   : > { %s493_s18 = sshll.u32 %s3163_s17, 4  ;;  %s3808_s8 = sld [smem:[#allocation26_spill]]  ;;  %s3304_s18 = int_to_ptr.vmem [resolvable:$true] %s493_s18 }
  0x1e   : > { %s3806_s28 = scalar_select %p3289_p3, 1, 0 }
  0x1f   : > { %p2702_p5 = pneg %p3289_p3 }
  0x21   : > { %p3298_p6 = pnand %p2702_p5, %p3785_p1 }
  0x23   : > { %s2877_s25 = scalar_lea.hbm %s3808_s8, 1024  ;;  %p3314_p8 = pneg %p3298_p6 }
  0x24   : > { %p2878_p7 = scmp.ne.s32.totalorder %s3808_s8, %s2877_s25  ;;  %p2884_p11 = scmp.lt.u32.totalorder %s2877_s25, %s3808_s8 }
  0x26   : > { %p2880_p9 = pnand %p3314_p8, %p2878_p7 }
  0x28   : > { %p2881_p10 = pneg %p2880_p9 }
  0x2a   : > { %p2886_p12 = pnand %p2884_p11, %p2881_p10 }
  0x2c   : > { %2889 = shalt.err (!%p2886_p12)
}
  0x2d   : > { %s2890_s15 = scalar_lea.vmem %s3287_s26, 1024  ;;  %p2898_p5 = scmp.lt.s32.totalorder %s3287_s26, %s3287_s26 }
  0x2e   : > { %p2891_p13 = scmp.ne.s32.totalorder %s3287_s26, %s2890_s15  ;;  %p2899_p4 = scmp.lt.s32.totalorder %s2890_s15, %s2890_s15 }
  0x30   : > { %p2893_p0 = pnand %p2891_p13, %p3314_p8  ;;  %p2900_p7 = por %p2899_p4, %p2898_p5 }
  0x32   : > { %p2894_p2 = pneg %p2893_p0 }
  0x34   : > { %p2901_p9 = pnand %p2900_p7, %p2894_p2 }
  0x36   : > { %2904 = shalt.err (!%p2901_p9)
}
  0x37   : > { %s3787_s16 = smov 64   ;;  %s3789_s14 = smov 4  }
  0x38   : > { %2705 = dma.hbm_to_vmem [thread:$0]  (!%p3298_p6), %s3808_s8, 1024, %s3287_s26, [#allocation6], %s3787_s16, %s3787_s16, %s3789_s14  }
  0x39   : > { %s3810_s9 = sld [smem:[#allocation27_spill]] }
  0x3f   : > { %s2905_s15 = scalar_lea.hbm %s3810_s9, 1024 }
  0x40   : > { %p2906_p4 = scmp.ne.s32.totalorder %s3810_s9, %s2905_s15  ;;  %p2912_p12 = scmp.lt.u32.totalorder %s2905_s15, %s3810_s9 }
  0x42   : > { %p2908_p10 = pnand %p2906_p4, %p3314_p8 }
  0x44   : > { %p2909_p11 = pneg %p2908_p10 }
  0x46   : > { %p2914_p13 = pnand %p2912_p12, %p2909_p11 }
  0x48   : > { %2917 = shalt.err (!%p2914_p13)
}
  0x49   : > { %s2918_s26 = scalar_lea.vmem %s3302_s30, 1024  ;;  %p2926_p7 = scmp.lt.s32.totalorder %s3302_s30, %s3302_s30 }
  0x4a   : > { %p2919_p0 = scmp.ne.s32.totalorder %s3302_s30, %s2918_s26  ;;  %p2927_p9 = scmp.lt.s32.totalorder %s2918_s26, %s2918_s26 }
  0x4c   : > { %p2921_p2 = pnand %p2919_p0, %p3314_p8  ;;  %p2928_p4 = por %p2927_p9, %p2926_p7 }
  0x4e   : > { %p2922_p5 = pneg %p2921_p2 }
  0x50   : > { %p2929_p10 = pnand %p2928_p4, %p2922_p5 }
  0x52   : > { %2932 = shalt.err (!%p2929_p10)
}
  0x53   : > { %2708 = dma.hbm_to_vmem [thread:$0]  (!%p3298_p6), %s3810_s9, 1024, %s3302_s30, [#allocation9], %s3787_s16, %s3787_s16, %s3789_s14  }
  0x54   : > { %s3811_s11 = sld [smem:[#allocation29_spill]] }
  0x5a   : > { %s2933_s19 = scalar_lea.hbm %s3811_s11, 1024 }
  0x5b   : > { %p2934_p11 = scmp.ne.s32.totalorder %s3811_s11, %s2933_s19  ;;  %p2940_p0 = scmp.lt.u32.totalorder %s2933_s19, %s3811_s11 }
  0x5d   : > { %p2936_p12 = pnand %p2934_p11, %p3314_p8 }
  0x5f   : > { %p2937_p13 = pneg %p2936_p12 }
  0x61   : > { %p2942_p2 = pnand %p2940_p0, %p2937_p13 }
  0x63   : > { %2945 = shalt.err (!%p2942_p2)
}
  0x64   : > { %s2946_s30 = scalar_lea.vmem %s3304_s18, 1024  ;;  %p2954_p4 = scmp.lt.s32.totalorder %s3304_s18, %s3304_s18 }
  0x65   : > { %p2947_p5 = scmp.ne.s32.totalorder %s3304_s18, %s2946_s30  ;;  %p2955_p10 = scmp.lt.s32.totalorder %s2946_s30, %s2946_s30 }
  0x67   : > { %p2949_p7 = pnand %p2947_p5, %p3314_p8  ;;  %p2956_p11 = por %p2955_p10, %p2954_p4 }
  0x69   : > { %p2950_p9 = pneg %p2949_p7 }
  0x6b   : > { %p2957_p12 = pnand %p2956_p11, %p2950_p9 }
  0x6d   : > { %2960 = shalt.err (!%p2957_p12)
}
  0x6e   : > { %2714 = dma.hbm_to_vmem [thread:$0]  (!%p3298_p6), %s3811_s11, 1024, %s3304_s18, [#allocation12], %s3787_s16, %s3787_s16, %s3789_s14  }
  0x6f   : > { %s3166_s5 = smov [#allocation10]   ;;  %s3167_s13 = smov [#allocation13]  }
  0x70   : > { %s480_s7 = sshll.u32 %s3166_s5, 4  ;;  %s506_s19 = sshll.u32 %s3167_s13, 4  ;;  %s481_s7 = int_to_ptr.vmem [resolvable:$true] %s480_s7  ;;  %s507_s19 = int_to_ptr.vmem [resolvable:$true] %s506_s19 }
  0x71   : > { %s3812_s10 = sld [smem:[#allocation28_spill]] }
  0x77   : > { %s2961_s17 = scalar_lea.hbm %s3812_s10, 1024 }
  0x78   : > { %p2962_p13 = scmp.ne.s32.totalorder %s3812_s10, %s2961_s17  ;;  %p2968_p5 = scmp.lt.u32.totalorder %s2961_s17, %s3812_s10 }
  0x7a   : > { %p2964_p0 = pnand %p2962_p13, %p3314_p8 }
  0x7c   : > { %p2965_p2 = pneg %p2964_p0 }
  0x7e   : > { %p2970_p7 = pnand %p2968_p5, %p2965_p2 }
  0x80   : > { %2973 = shalt.err (!%p2970_p7)
}
  0x81   : > { %s2974_s18 = scalar_lea.vmem %s481_s7, 1024  ;;  %p2982_p11 = scmp.lt.s32.totalorder %s481_s7, %s481_s7 }
  0x82   : > { %p2975_p9 = scmp.ne.s32.totalorder %s481_s7, %s2974_s18  ;;  %p2983_p12 = scmp.lt.s32.totalorder %s2974_s18, %s2974_s18 }
  0x84   : > { %p2977_p4 = pnand %p2975_p9, %p3314_p8  ;;  %p2984_p1 = por %p2983_p12, %p2982_p11 }
  0x86   : > { %p2978_p10 = pneg %p2977_p4 }
  0x88   : > { %p2985_p3 = pnand %p2984_p1, %p2978_p10 }
  0x8a   : > { %2988 = shalt.err (!%p2985_p3)
}
  0x8b   : > { %2711 = dma.hbm_to_vmem [thread:$0]  (!%p3298_p6), %s3812_s10, 1024, %s481_s7, [#allocation9], %s3787_s16, %s3787_s16, %s3789_s14  }
  0x8c   : > { %s3813_s12 = sld [smem:[#allocation30_spill]] }
  0x92   : > { %s2989_s20 = scalar_lea.hbm %s3813_s12, 1024 }
  0x93   : > { %p2990_p1 = scmp.ne.s32.totalorder %s3813_s12, %s2989_s20  ;;  %p2996_p0 = scmp.lt.u32.totalorder %s2989_s20, %s3813_s12 }
  0x95   : > { %p2992_p3 = pnand %p2990_p1, %p3314_p8 }
  0x97   : > { %p2993_p13 = pneg %p2992_p3 }
  0x99   : > { %p2998_p2 = pnand %p2996_p0, %p2993_p13 }
  0x9b   : > { %3001 = shalt.err (!%p2998_p2)
}
  0x9c   : > { %s3002_s26 = scalar_lea.vmem %s507_s19, 1024  ;;  %p3010_p4 = scmp.lt.s32.totalorder %s507_s19, %s507_s19 }
  0x9d   : > { %p3003_p5 = scmp.ne.s32.totalorder %s507_s19, %s3002_s26  ;;  %p3011_p10 = scmp.lt.s32.totalorder %s3002_s26, %s3002_s26 }
  0x9f   : > { %p3005_p7 = pnand %p3003_p5, %p3314_p8  ;;  %p3012_p11 = por %p3011_p10, %p3010_p4 }
  0xa1   : > { %p3006_p9 = pneg %p3005_p7 }
  0xa3   : > { %p3013_p12 = pnand %p3012_p11, %p3006_p9 }
  0xa5   : > { %3016 = shalt.err (!%p3013_p12)
}
  0xa6   : > { %2717 = dma.hbm_to_vmem [thread:$0]  (!%p3298_p6), %s3813_s12, 1024, %s507_s19, [#allocation12], %s3787_s16, %s3787_s16, %s3789_s14  }
  0xa7   : > { %s2272_s0 = sadd.s32 4294967294, %s3159_s24   ;;  %s3434_s29 = sadd.s32 1, %s3159_s24  }
  0xa8   : > { %s70_s8 = sadd.s32 1, %s3155_s23  ;;  %s67_s4 = ssub.s32 %s3159_s24, %s3434_s29 }
  0xa9   : > { %p77_p8 = scmp.ne.s32.totalorder %s3155_s23, %s3151_s22  ;;  %p68_p1 = scmp.eq.s32.totalorder %s67_s4, 0 }
  0xaa   : > { %p78_p3 = scmp.eq.s32.totalorder %s3159_s24, 0  ;;  %p83_p13 = scmp.ne.s32.totalorder %s3151_s22, %s3147_s21 }
  0xab   : > { %p426_p0 = scmp.eq.s32.totalorder %s3282_s27, 1  ;;  %p3814_p5 = scmp.eq.s32.totalorder %s3282_s27, 0 }
  0xac   : > { %s3446_s5 = scalar_select %p68_p1, %s3155_s23, %s70_s8  }
  0xad   : > { %p79_p2 = por %p78_p3, %p77_p8  ;;  %p3450_p7 = por %p3814_p5, %p83_p13 }
  0xae   : > { %p3454_p6 = por %p426_p0, %p77_p8  ;;  %p432_p9 = scmp.eq.s32.totalorder %s2272_s0, 1 }
  0xaf   : > { %p2734_p4 = scmp.lt.s32.totalorder %s3159_s24, 2  ;;  %s3460_s20 = sand.u32 1, %s3155_s23  }
  0xb0   : > { %s3816_s13 = scalar_select %p3454_p6, 1, 0 }
  0xb1   : > { %p3462_p10 = por %p432_p9, %p83_p13  ;;  %s2280_s17 = sshll.u32 %s3460_s20, 4 }
  0xb2   : > { %s2391_s15 = sshll.u32 %s3159_s24, 8  ;;  %s3818_s1 = sld [smem:[#allocation22_spill]] }
  0xb3   : > { %s3817_s25 = scalar_select %p3462_p10, 1, 0 }
  0xb4   : > { %s543_s18 = scalar_lea.vmem [#allocation2], %s2280_s17  ;;  %p3473_p11 = pnand %p2734_p4, %p79_p2 }
  0xb5   : > { %s551_s0 = sshll.u32 %s543_s18, 4  ;;  %s540_s16 = scalar_lea.sflag [#allocation3], %s3460_s20  ;;  %s3477_s0 = int_to_ptr.vmem [resolvable:$true] %s551_s0 }
  0xb6   : > { %p3019_p8 = pneg %p3473_p11 }
  0xb8   : > { %s3471_s7 = scalar_lea.hbm %s3818_s1, %s2391_s15  ;;  %s3022_s30 = scalar_lea.hbm %s3818_s1, 512 }
  0xb9   : > { %s3017_s14 = scalar_lea.hbm %s3471_s7, 256  ;;  %p3023_p13 = scmp.lt.u32.totalorder %s3471_s7, %s3818_s1 }
  0xba   : > { %p3018_p12 = scmp.ne.s32.totalorder %s3471_s7, %s3017_s14  ;;  %p3024_p0 = scmp.lt.u32.totalorder %s3022_s30, %s3017_s14 }
  0xbb   : > { %p3026_p5 = scmp.lt.u32.totalorder %s3017_s14, %s3471_s7 }
  0xbc   : > { %p3020_p1 = pnand %p3019_p8, %p3018_p12  ;;  %p3025_p2 = por %p3024_p0, %p3023_p13 }
  0xbe   : > { %p3021_p3 = pneg %p3020_p1  ;;  %p3027_p9 = por %p3026_p5, %p3025_p2 }
  0xc0   : > { %p3028_p4 = pnand %p3027_p9, %p3021_p3 }
  0xc2   : > { %3031 = shalt.err (!%p3028_p4)
}
  0xc3   : > { %s3032_s4 = scalar_lea.vmem %s3477_s0, 256  ;;  %s3168_s17 = smov [#allocation2]  }
  0xc4   : > { %p3033_p12 = scmp.ne.s32.totalorder %s3477_s0, %s3032_s4  ;;  %s3037_s15 = sshll.u32 %s3168_s17, 4  ;;  %s3038_s15 = int_to_ptr.vmem [resolvable:$false] %s3037_s15 }
  0xc5   : > { %s3039_s26 = scalar_lea.vmem %s3038_s15, 512  ;;  %p3040_p6 = scmp.lt.s32.totalorder %s3477_s0, %s3038_s15 }
  0xc6   : > { %p3035_p1 = pnand %p3033_p12, %p3019_p8  ;;  %p3041_p13 = scmp.lt.s32.totalorder %s3039_s26, %s3032_s4 }
  0xc8   : > { %p3036_p10 = pneg %p3035_p1  ;;  %p3042_p0 = por %p3041_p13, %p3040_p6 }
  0xca   : > { %p3043_p2 = pnand %p3042_p0, %p3036_p10 }
  0xcc   : > { %3046 = shalt.err (!%p3043_p2)
}
  0xcd   : > { %s3820_s14 = smov 4   ;;  %s3821_s30 = smov 64  }
  0xce   : > { %2721 = dma.hbm_to_vmem [thread:$0]  (!%p3473_p11), %s3471_s7, 256, %s3477_s0, %s540_s16, %s3821_s30, %s3821_s30, %s3820_s14  }
  0xcf   : > { %s2284_s18 = sshll.u32 %s3460_s20, 3  ;;  %s2392_s17 = sshll.u32 %s3159_s24, 7 }
  0xd0   : > { %s3516_s26 = scalar_lea.hbm %s3768_s2, %s2392_s17  ;;  %s565_s1 = scalar_lea.vmem [#allocation5], %s2284_s18 }
  0xd1   : > { %s572_s9 = sshll.u32 %s565_s1, 4  ;;  %s3822_s10 = sand.u32 1, %s3159_s24   ;;  %s3518_s9 = int_to_ptr.vmem [resolvable:$true] %s572_s9 }
  0xd2   : > { %s3522_s11 = scalar_lea.sflag [#allocation6], %s3822_s10  ;;  %s3047_s12 = scalar_lea.hbm %s3516_s26, 128 }
  0xd3   : > { %p3048_p6 = scmp.ne.s32.totalorder %s3516_s26, %s3047_s12  ;;  %s3052_s7 = scalar_lea.hbm %s3768_s2, 256 }
  0xd4   : > { %p3053_p5 = scmp.lt.u32.totalorder %s3516_s26, %s3768_s2  ;;  %p3054_p9 = scmp.lt.u32.totalorder %s3052_s7, %s3047_s12 }
  0xd5   : > { %p3050_p10 = pnand %p3048_p6, %p3019_p8  ;;  %p3056_p12 = scmp.lt.u32.totalorder %s3047_s12, %s3516_s26 }
  0xd6   : > { %p3055_p4 = por %p3054_p9, %p3053_p5 }
  0xd7   : > { %p3051_p3 = pneg %p3050_p10 }
  0xd8   : > { %p3057_p1 = por %p3056_p12, %p3055_p4 }
  0xda   : > { %p3058_p13 = pnand %p3057_p1, %p3051_p3 }
  0xdc   : > { %3061 = shalt.err (!%p3058_p13)
}
  0xdd   : > { %s3062_s1 = scalar_lea.vmem %s3518_s9, 128  ;;  %s3169_s10 = smov [#allocation5]  }
  0xde   : > { %p3063_p0 = scmp.ne.s32.totalorder %s3518_s9, %s3062_s1  ;;  %s3067_s18 = sshll.u32 %s3169_s10, 4  ;;  %s3068_s18 = int_to_ptr.vmem [resolvable:$false] %s3067_s18 }
  0xdf   : > { %s3069_s4 = scalar_lea.vmem %s3068_s18, 256  ;;  %p3070_p10 = scmp.lt.s32.totalorder %s3518_s9, %s3068_s18 }
  0xe0   : > { %p3065_p2 = pnand %p3063_p0, %p3019_p8  ;;  %p3071_p5 = scmp.lt.s32.totalorder %s3069_s4, %s3062_s1 }
  0xe2   : > { %p3066_p6 = pneg %p3065_p2  ;;  %p3072_p9 = por %p3071_p5, %p3070_p10 }
  0xe4   : > { %p3073_p4 = pnand %p3072_p9, %p3066_p6 }
  0xe6   : > { %3076 = shalt.err (!%p3073_p4)
}
  0xe7   : > { %2724 = dma.hbm_to_vmem [thread:$0]  (!%p3473_p11), %s3516_s26, 128, %s3518_s9, %s3522_s11, %s3821_s30, %s3821_s30, %s3820_s14  }
  0xe8   : > { %p3823_p8 = scmp.ne.s32.totalorder %s3806_s28, 0 }
  0xe9   : > { %s3554_s12 = sand.u32 (!%p3823_p8), 1, %s3151_s22  }
  0xea   : > { %623 = sbr.rel (%p3823_p8) target bundleno = 1697 (0x6a1), region = 84  ;;  %s2288_s15 = sshll.u32 (!%p3823_p8), %s3554_s12, 4 }
  0xeb   : > { %s626_s16 = scalar_lea.sflag (!%p3823_p8), [#allocation3], %s3554_s12  ;;  %s3560_s8 = scalar_lea.vmem (!%p3823_p8), [#allocation2], %s2288_s15 }
  0xf1   : > { %3122 = dma.done.wait (%p3450_p7), %s626_s16, 256  }
  0xf2   : > { %3124 = vsyncadd (%p3450_p7), %s626_s16, 4294967040  ;;  %s634_s9 = sand.u32 1, %s3282_s27   ;;  %s2289_s11 = sshll.u32 %s3554_s12, 3 }
  0xf3   : > { %s635_s28 = scalar_lea.sflag [#allocation6], %s634_s9  ;;  %s3568_s14 = scalar_lea.vmem [#allocation5], %s2289_s11 }
  0xf4   : > { %3126 = dma.done.wait (%p3450_p7), %s635_s28, 128  }
  0xf5   : > { %3128 = vsyncadd (%p3450_p7), %s635_s28, 4294967168  ;;  %p3824_p11 = scmp.eq.s32.totalorder %s3282_s27, 0 }
  0xf7   : > { %3130 = dma.done.wait (%p3824_p11), [#allocation6], 1024   ;;  %p3825_p3 = pmov %p3824_p11 }
  0xf9   : > { %3132 = vsyncadd (%p3825_p3), [#allocation6], 4294966272  ;;  %p3826_p12 = pmov %p3825_p3 }
  0xfa   : > { %p3827_p1 = pmov %p3825_p3 }
  0xfb   : > { %3134 = dma.done.wait (%p3826_p12), [#allocation9], 2048  }
  0xfc   : > { %3136 = vsyncadd (%p3827_p1), [#allocation9], 4294965248  ;;  %p3828_p13 = pmov %p3827_p1 }
  0xfd   : > { %p3829_p0 = pmov %p3827_p1 }
  0xfe   : > { %3138 = dma.done.wait (%p3828_p13), [#allocation12], 2048  }
  0xff   : > { %3140 = vsyncadd (%p3829_p0), [#allocation12], 4294965248  ;;  %s2296_s19 = sshll.u32 %s3282_s27, 1  ;;  %v3170_v0 = vmov 0   ;;  %s3830_s10 = sld [smem:[#allocation21_spill]]  ;;  %vm885_vm0 = vcmask 523264  }
 0x100   : > { %p742_p7 = scmp.lt.s32.totalorder %s2296_s19, 3  ;;  %2785 = vset.pattern.permute.xlu0 %v3170_v0  ;;  %2786 = vset.pattern.permute.xlu1 %v3170_v0  ;;  %v2799_v25 = vld [vmem:[#allocation10] sm:$0xff]   ;;  %s3832_s17 = sld [smem:[#allocation24_spill]]  ;;  %v2800_v30 = vld [vmem:[#allocation10 + $0x8] sm:$0xff]   ;;  %v2801_v35 = vld [vmem:[#allocation10 + $0x10] sm:$0xff]   ;;  %vm3172_vm1 = vmmov 0  }
 0x101   : > { %v2802_v38 = vld [vmem:[#allocation10 + $0x18] sm:$0xff]   ;;  %v2803_v41 = vld [vmem:[#allocation10 + $0x20] sm:$0xff]   ;;  %v2804_v44 = vld [vmem:[#allocation10 + $0x28] sm:$0xff]   ;;  %vm1384_vm2 = vcmask 261120   ;;  %s3835_s28 = sld [smem:[#allocation32_spill]]  ;;  %vm1753_vm3 = vcmask 130048  }
 0x102   : > { %s3846_s19 = smov (!%p742_p7, %s2296_s19), 3  ;;  %v2805_v47 = vld [vmem:[#allocation10 + $0x30] sm:$0xff]   ;;  %v2806_v48 = vld [vmem:[#allocation10 + $0x38] sm:$0xff]   ;;  %p3838_p6 = scmp.ne.s32.totalorder %s3816_s13, 0 }
 0x103   : > { %s2394_s30 = sshll.u32 %s3846_s19, 5  ;;  %s2393_s0 = sshll.u32 %s3846_s19, 4 }
 0x104   : > { %s775_s7 = scalar_lea.vmem %s3772_s6, %s2394_s30  ;;  %s755_s9 = scalar_lea.vmem %s3769_s3, %s2394_s30 }
 0x105   : > { %v3593_v1 = vld [vmem:[%s775_s7] sm:$0xff]   ;;  %v3598_v3 = vld [vmem:[%s775_s7 + $0x8] sm:$0xff]   ;;  %v2791_v5 = vld [vmem:[%s775_s7 + $0x10] sm:$0xff]   ;;  %s746_s18 = scalar_lea.vmem %s3830_s10, %s2393_s0  ;;  %s3831_s30 = sld [smem:[#allocation23_spill]] }
 0x106   : > { %v3595_v2 = vld [vmem:[%s775_s7 + $0x20] sm:$0xff]   ;;  %2484 = vmatprep.subr.bf16.mxu0 %v3593_v1  ;;  %v3603_v4 = vld [vmem:[%s775_s7 + $0x28] sm:$0xff]   ;;  %v2792_v6 = vld [vmem:[%s775_s7 + $0x30] sm:$0xff]   ;;  %s2306_s20 = sshll.u32 %s3846_s19, 3  ;;  %s3837_s19 = sld [smem:[#allocation34_spill]] }
 0x107   : > { %2496 = vmatprep.subr.bf16.mxu1 %v3595_v2  ;;  %2485 = vmatpush3.bf16.msra.mxu0 %v3593_v1  ;;  %v2793_v7 = vld [vmem:[%s775_s7 + $0x18] sm:$0xff]   ;;  %v2795_v9 = vld [vmem:[%s746_s18] sm:$0xff]   ;;  %v2796_v10 = vld [vmem:[%s746_s18 + $0x10] sm:$0xff]   ;;  %s768_s1 = scalar_lea.vmem %s3832_s17, %s2306_s20  ;;  %s740_s20 = scalar_lea.vmem [#allocation14], %s2288_s15 }
 0x108   : > { %2497 = vmatpush3.bf16.msra.mxu1 %v3595_v2  ;;  %2486 = vmatprep.subr.bf16.mxu0 %v3598_v3  ;;  %v2794_v8 = vld [vmem:[%s775_s7 + $0x38] sm:$0xff]   ;;  %v835_v11 = vld [vmem:[%s755_s9] sm:$0xff]  ;;  %v837_v12 = vld [vmem:[%s755_s9 + $0x10] sm:$0xff]  ;;  %s2069_s7 = sshll.u32 %s740_s20, 4  ;;  %s2056_s15 = scalar_lea.sflag [#allocation4], %s3554_s12  ;;  %s3717_s7 = int_to_ptr.vmem [resolvable:$true] %s2069_s7 }
 0x109   : > { %2498 = vmatprep.subr.bf16.mxu1 %v3603_v4  ;;  %2492 = vmatprep.mubr.msk.bf16.mxu0 %vm885_vm0, %v2795_v9  ;;  %v836_v13 = vld [vmem:[%s755_s9 + $0x8] sm:$0xff]  ;;  %2849 = vrcp.f32 %v835_v11  ;;  %v838_v14 = vld [vmem:[%s755_s9 + $0x18] sm:$0xff]  ;;  %v839_v17 = vld [vmem:[%s755_s9 + $0x20] sm:$0xff]  ;;  %s3077_s4 = scalar_lea.vmem %s3717_s7, 256 }
 0x10a   : > { %2504 = vmatprep.mubr.msk.bf16.mxu1 %vm885_vm0, %v2796_v10  ;;  %v2797_v15 = vld [vmem:[%s746_s18 + $0x8] sm:$0xff]   ;;  %2851 = vrcp.f32 %v837_v12  ;;  %v2798_v16 = vld [vmem:[%s746_s18 + $0x18] sm:$0xff]   ;;  %v841_v19 = vld [vmem:[%s755_s9 + $0x30] sm:$0xff]  ;;  %s3833_s18 = sld [smem:[#allocation25_spill]]  ;;  %p3078_p2 = scmp.ne.s32.totalorder %s3717_s7, %s3077_s4 }
 0x10b   : > { %2487 = vmatpush3.bf16.msra.mxu0 %v3598_v3  ;;  %2853 = vrcp.f32 %v836_v13  ;;  %v840_v18 = vld [vmem:[%s755_s9 + $0x28] sm:$0xff]  ;;  %s762_s26 = scalar_lea.vmem %s3831_s30, %s2393_s0  ;;  %v842_v20 = vld [vmem:[%s755_s9 + $0x38] sm:$0xff]  ;;  %v1749_v33 = vld [vmem:[%s768_s1] sm:$0xff]  ;;  %s3834_s9 = sld [smem:[#allocation31_spill]] }
 0x10c   : > { %2499 = vmatpush3.bf16.msra.mxu1 %v3603_v4  ;;  %2488 = vmatprep.subr.bf16.mxu0 %v2791_v5  ;;  %2855 = vrcp.f32 %v838_v14  ;;  %v1371_v21 = vld [vmem:[%s762_s26] sm:$0xff]  ;;  %v1372_v23 = vld [vmem:[%s762_s26 + $0x8] sm:$0xff]  ;;  %v1373_v28 = vld [vmem:[%s762_s26 + $0x10] sm:$0xff]  ;;  %s2399_s0 = sshll.u32 %s3282_s27, 8  ;;  %p3079_p10 = pnand %p3078_p2, %p3838_p6 }
 0x10d   : > { %2500 = vmatprep.subr.bf16.mxu1 %v2792_v6  ;;  %2857 = vrcp.f32 %v839_v17  ;;  %v1374_v29 = vld [vmem:[%s762_s26 + $0x18] sm:$0xff]  ;;  %v1750_v34 = vld [vmem:[%s768_s1 + $0x8] sm:$0xff]  ;;  %s3836_s26 = sld [smem:[#allocation33_spill]]  ;;  %s3722_s10 = scalar_lea.hbm %s3837_s19, %s2399_s0 }
 0x10e   : > { %2859 = vrcp.f32 %v840_v18  ;;  %p3080_p5 = pneg %p3079_p10  ;;  %s3173_s27 = smov [#allocation14]  }
 0x10f   : > { %2489 = vmatpush3.bf16.msra.mxu0 %v2791_v5  ;;  %2861 = vrcp.f32 %v841_v19  ;;  %s3081_s16 = sshll.u32 %s3173_s27, 4  ;;  %s3082_s16 = int_to_ptr.vmem [resolvable:$false] %s3081_s16 }
 0x110   : > { %2501 = vmatpush3.bf16.msra.mxu1 %v2792_v6  ;;  %2490 = vmatprep.subr.bf16.mxu0 %v2793_v7  ;;  %2863 = vrcp.f32 %v842_v20  ;;  %v2807_v49 = vld [vmem:[%s3833_s18] sm:$0xff]   ;;  %v2808_v18 = vld [vmem:[%s3833_s18 + $0x8] sm:$0xff]   ;;  %v2809_v19 = vld [vmem:[%s3833_s18 + $0x10] sm:$0xff]   ;;  %p3084_p9 = scmp.lt.s32.totalorder %s3717_s7, %s3082_s16 }
 0x111   : > { %2502 = vmatprep.subr.bf16.mxu1 %v2794_v8  ;;  %2865 = vrcp.f32 %v1371_v21  ;;  %v2810_v20 = vld [vmem:[%s3833_s18 + $0x18] sm:$0xff]   ;;  %v2811_v21 = vld [vmem:[%s3833_s18 + $0x20] sm:$0xff]  }
 0x112   : > { %2867 = vrcp.f32 %v1372_v23  ;;  %v2813_v23 = vld [vmem:[%s3833_s18 + $0x30] sm:$0xff]  }
 0x113   : > { %2491 = vmatpush3.bf16.msra.mxu0 %v2793_v7  ;;  %v2850_v22 = vpop.eup %2849  ;;  %2869 = vrcp.f32 %v1373_v28 }
 0x114   : > { %2503 = vmatpush3.bf16.msra.mxu1 %v2794_v8  ;;  %v2852_v24 = vpop.eup %2851  ;;  %1032 = vperm.xlu0 %2785, %v2850_v22   ;;  %2871 = vrcp.f32 %v1374_v29  ;;  %v2812_v22 = vld [vmem:[%s3833_s18 + $0x28] sm:$0xff]  }
 0x115   : > { %v2854_v26 = vpop.eup %2853  ;;  %1042 = vperm.xlu1 %2786, %v2852_v24   ;;  %2508 = vmatprep.subr.bf16.mxu0 %v2799_v25  ;;  %2873 = vrcp.f32 %v1749_v33  ;;  %v3171_v24 = vmov 0.0  }
 0x116   : > { %2493 = vmatmul.mubr.msk.bf16.vlgmr.msra.gmra.mrb[0].mxu0 %vm885_vm0, %v2797_v15  ;;  %v2856_v27 = vpop.eup %2855  ;;  %2875 = vrcp.f32 %v1750_v34  ;;  %2556 = vmatprep.subr.bf16.mxu1 %v3171_v24 }
 0x117   : > { %2505 = vmatmul.mubr.msk.bf16.vlgmr.msra.gmra.mrb[0].mxu1 %vm885_vm0, %v2798_v16  ;;  %2509 = vmatpush3.bf16.msra.mxu0 %v2799_v25  ;;  %v2858_v31 = vpop.eup %2857 }
 0x118   : > { %1037 = vperm.xlu0 %2785, %v2854_v26   ;;  %v2860_v32 = vpop.eup %2859  ;;  %2510 = vmatprep.subr.bf16.mxu0 %v2800_v30 }
 0x119   : > { %1047 = vperm.xlu1 %2786, %v2856_v27   ;;  %v2862_v36 = vpop.eup %2861  ;;  %2560 = vmatprep.mubr.msk.bf16.mxu1 %vm3172_vm1, %v3171_v24 }
 0x11a   : > { %v2864_v37 = vpop.eup %2863 }
 0x11b   : > { %2511 = vmatpush3.bf16.msra.mxu0 %v2800_v30  ;;  %v2866_v39 = vpop.eup %2865 }
 0x11c   : > { %1052 = vperm.xlu0 %2785, %v2858_v31   ;;  %2512 = vmatprep.subr.bf16.mxu0 %v2801_v35  ;;  %v2868_v40 = vpop.eup %2867 }
 0x11d   : > { %1057 = vperm.xlu1 %2786, %v2860_v32   ;;  %v2870_v42 = vpop.eup %2869 }
 0x11e   : > { %v2872_v43 = vpop.eup %2871 }
 0x11f   : > { %2513 = vmatpush3.bf16.msra.mxu0 %v2801_v35  ;;  %v2874_v45 = vpop.eup %2873 }
 0x120   : > { %1062 = vperm.xlu0 %2785, %v2862_v36   ;;  %2514 = vmatprep.subr.bf16.mxu0 %v2802_v38  ;;  %v2876_v46 = vpop.eup %2875 }
 0x121   : > { %1067 = vperm.xlu1 %2786, %v2864_v37  }
 0x123   : > { %2515 = vmatpush3.bf16.msra.mxu0 %v2802_v38 }
 0x124   : > { %1480 = vperm.xlu0 %2785, %v2866_v39   ;;  %2516 = vmatprep.subr.bf16.mxu0 %v2803_v41 }
 0x125   : > { %1485 = vperm.xlu1 %2786, %v2868_v40  }
 0x127   : > { %2517 = vmatpush3.bf16.msra.mxu0 %v2803_v41 }
 0x128   : > { %1490 = vperm.xlu0 %2785, %v2870_v42   ;;  %2518 = vmatprep.subr.bf16.mxu0 %v2804_v44 }
 0x129   : > { %1495 = vperm.xlu1 %2786, %v2872_v43  }
 0x12b   : > { %2519 = vmatpush3.bf16.msra.mxu0 %v2804_v44 }
 0x12c   : > { %1842 = vperm.xlu0 %2785, %v2874_v45   ;;  %2520 = vmatprep.subr.bf16.mxu0 %v2805_v47 }
 0x12d   : > { %1847 = vperm.xlu1 %2786, %v2876_v46  }
 0x12f   : > { %2521 = vmatpush3.bf16.msra.mxu0 %v2805_v47  ;;  %v2815_v47 = vld [vmem:[%s3560_s8] sm:$0xff]  }
 0x130   : > { %2522 = vmatprep.subr.bf16.mxu0 %v2806_v48 }
 0x133   : > { %2523 = vmatpush3.bf16.msra.mxu0 %v2806_v48 }
 0x134   : > { %2532 = vmatprep.subr.bf16.mxu0 %v2807_v49 }
 0x193   : > { %v1033_v50 = vpop.permute.xlu0 %1032 }
 0x194   : > { %v1043_v51 = vpop.permute.xlu1 %1042 }
 0x197   : > { %v1038_v52 = vpop.permute.xlu0 %1037 }
 0x198   : > { %v1048_v53 = vpop.permute.xlu1 %1047 }
 0x19b   : > { %v1053_v54 = vpop.permute.xlu0 %1052 }
 0x19c   : > { %v1058_v55 = vpop.permute.xlu1 %1057 }
 0x19f   : > { %v1063_v56 = vpop.permute.xlu0 %1062 }
 0x1a0   : > { %v1068_v57 = vpop.permute.xlu1 %1067 }
 0x1e9   : > { %v2494_v58 = vpop.f32.mrb[0].mxu0 }
 0x1ea   : > { %v2506_v59 = vpop.f32.mrb[0].mxu1  ;;  %v926_v60 = vpop.f32.mrb[1].mxu0  ;;  %v1072_v63 = vmul.f32 %v2494_v58, %v1043_v51  ;;  %v2822_v58 = vld [vmem:[#allocation11 + $0x28] sm:$0xff]  }
 0x1eb   : > { %v1015_v61 = vpop.f32.mrb[1].mxu1  ;;  %v2495_v62 = vpop.f32.mrb[2].mxu0  ;;  %v1076_v7 = vmul.f32 %v2506_v59, %v1063_v56  ;;  %v1070_v8 = vmul.f32 %v1033_v50, %v926_v60  ;;  %v2820_v56 = vld [vmem:[#allocation11 + $0x18] sm:$0xff]   ;;  %v2823_v59 = vld [vmem:[#allocation11 + $0x30] sm:$0xff]  }
 0x1ec   : > { %v1073_v0 = vmul.f32 %v2495_v62, %v1048_v53  ;;  %v2507_v5 = vpop.f32.mrb[2].mxu1  ;;  %v929_v6 = vpop.f32.mrb[3].mxu0  ;;  %v1074_v12 = vmul.f32 %v1053_v54, %v1015_v61  ;;  %v2816_v53 = vld [vmem:[%s3560_s8 + $0x8] sm:$0xff]   ;;  %v2825_v61 = vld [vmem:[#allocation7] sm:$0xff]  }
 0x1ed   : > { %v1077_v9 = vmul.f32 %v2507_v5, %v1068_v57  ;;  %v1071_v10 = vmul.f32 %v1038_v52, %v929_v6  ;;  %v1018_v11 = vpop.f32.mrb[3].mxu1  ;;  %v2817_v52 = vld [vmem:[#allocation11] sm:$0xff]   ;;  %v2818_v54 = vld [vmem:[#allocation11 + $0x8] sm:$0xff]   ;;  %v2824_v60 = vld [vmem:[#allocation11 + $0x38] sm:$0xff]   ;;  %v1486_v5 = vpop.permute.xlu1 %1485 }
 0x1ee   : > { %v1079_v13 = vpack.c.bf16 %v1073_v0, %v1072_v63  ;;  %v1075_v14 = vmul.f32 %v1058_v55, %v1018_v11  ;;  %v2819_v55 = vld [vmem:[#allocation11 + $0x10] sm:$0xff]   ;;  %v2821_v57 = vld [vmem:[#allocation11 + $0x20] sm:$0xff]   ;;  %v1481_v63 = vpop.permute.xlu0 %1480 }
 0x1ef   : > { %v1081_v15 = vpack.c.bf16 %v1077_v9, %v1076_v7  ;;  %v1078_v16 = vpack.c.bf16 %v1071_v10, %v1070_v8 }
 0x1f0   : > { %v1080_v17 = vpack.c.bf16 %v1075_v14, %v1074_v12 }
 0x1f1   : > { %2524 = vmatprep.mubr.bf16.mxu0 %v1078_v16  ;;  %v1496_v14 = vpop.permute.xlu1 %1495 }
 0x1f2   : > { %2525 = vmatmul.mubr.bf16.vlgmr.msra.gmra.mrb[4].mxu0 %v1079_v13  ;;  %v1491_v12 = vpop.permute.xlu0 %1490 }
 0x1f3   : > { %2533 = vmatpush3.bf16.msra.mxu0 %v2807_v49  ;;  %2528 = vmatprep.mubr.bf16.mxu0 %v1080_v17 }
 0x1f4   : > { %2534 = vmatprep.subr.bf16.mxu0 %v2808_v18 }
 0x1f7   : > { %2535 = vmatpush3.bf16.msra.mxu0 %v2808_v18 }
 0x1f8   : > { %2536 = vmatprep.subr.bf16.mxu0 %v2809_v19 }
 0x1fa   : > { %2529 = vmatmul.mubr.bf16.gmra.mrb[8].mxu0 %v1081_v15 }
 0x1fb   : > { %2537 = vmatpush3.bf16.msra.mxu0 %v2809_v19  ;;  %2548 = vmatprep.mubr.bf16.mxu0 %v3593_v1  ;;  %v2814_v1 = vld [vmem:[%s3833_s18 + $0x38] sm:$0xff]  }
 0x1fc   : > { %2538 = vmatprep.subr.bf16.mxu0 %v2810_v20 }
 0x1ff   : > { %2539 = vmatpush3.bf16.msra.mxu0 %v2810_v20  ;;  %v2826_v20 = vld [vmem:[#allocation7 + $0x8] sm:$0xff]  }
 0x200   : > { %2540 = vmatprep.subr.bf16.mxu0 %v2811_v21 }
 0x203   : > { %2541 = vmatpush3.bf16.msra.mxu0 %v2811_v21  ;;  %v2827_v21 = vld [vmem:[#allocation7 + $0x10] sm:$0xff]  }
 0x204   : > { %2542 = vmatprep.subr.bf16.mxu0 %v2812_v22 }
 0x207   : > { %2543 = vmatpush3.bf16.msra.mxu0 %v2812_v22  ;;  %v2828_v22 = vld [vmem:[#allocation7 + $0x18] sm:$0xff]  }
 0x208   : > { %2544 = vmatprep.subr.bf16.mxu0 %v2813_v23 }
 0x20b   : > { %2545 = vmatpush3.bf16.msra.mxu0 %v2813_v23  ;;  %v2829_v23 = vld [vmem:[#allocation7 + $0x20] sm:$0xff]  }
 0x20c   : > { %2546 = vmatprep.subr.bf16.mxu0 %v2814_v1 }
 0x20f   : > { %2547 = vmatpush3.bf16.msra.mxu0 %v2814_v1  ;;  %v2830_v1 = vld [vmem:[#allocation7 + $0x28] sm:$0xff]  }
 0x210   : > { %2612 = vmatprep.subr.bf16.mxu0 %v3171_v24 }
 0x212   : > { %2549 = vmatmul.mubr.bf16.vlgmr.msra.gmra.mrb[4].mxu0 %v3598_v3  ;;  %v2342_v3 = vld [vmem:[%s3834_s9] ss:$0 sm:$0xff]  ;;  %s3083_s9 = scalar_lea.vmem %s3082_s16, 512 }
 0x213   : > { %2552 = vmatprep.mubr.bf16.mxu0 %v3595_v2  ;;  %p3085_p4 = scmp.lt.s32.totalorder %s3083_s9, %s3077_s4 }
 0x215   : > { %p3086_p8 = por %p3085_p4, %p3084_p9 }
 0x217   : > { %p3087_p11 = pnand %p3086_p8, %p3080_p5 }
 0x21a   : > { %2553 = vmatmul.mubr.bf16.gmra.mrb[8].mxu0 %v3603_v4 }
 0x21b   : > { %2614 = vmatprep.mubr.msk.bf16.mxu0 %vm3172_vm1, %v3171_v24 }
 0x2e5   : > { %v2550_v25 = vpop.f32.mrb[4].mxu0 }
 0x2e6   : > { %v1317_v2 = vadd.f32 %v2550_v25, %v2342_v3  ;;  %v1277_v26 = vpop.f32.mrb[5].mxu0  ;;  %v2832_v25 = vld [vmem:[#allocation7 + $0x38] sm:$0xff]  }
 0x2e7   : > { %v1315_v4 = vadd.f32 %v2342_v3, %v1277_v26  ;;  %v2551_v27 = vpop.f32.mrb[6].mxu0  ;;  %v2842_v26 = vld [vmem:[#allocation13 + $0x8] sm:$0xff]  }
 0x2e8   : > { %v1318_v28 = vadd.f32 %v2551_v27, %v2342_v3  ;;  %v1280_v29 = vpop.f32.mrb[7].mxu0  ;;  %v1325_v31 = vmax.f32 %v1317_v2, 0.0  ;;  %v2841_v2 = vld [vmem:[#allocation13] sm:$0xff]   ;;  %v2844_v27 = vld [vmem:[#allocation13 + $0x18] sm:$0xff]  }
 0x2e9   : > { %v1316_v30 = vadd.f32 %v2342_v3, %v1280_v29  ;;  %v1323_v33 = vmax.f32 %v1315_v4, 0.0  ;;  %v2843_v4 = vld [vmem:[#allocation13 + $0x10] sm:$0xff]  }
 0x2ea   : > { %v1326_v32 = vmax.f32 %v1318_v28, 0.0  ;;  %v2845_v28 = vld [vmem:[#allocation13 + $0x20] sm:$0xff]   ;;  %v2363_v29 = vld [vmem:[%s3835_s28] ss:$0 sm:$0xff] }
 0x2eb   : > { %v1324_v34 = vmax.f32 %v1316_v30, 0.0 }
 0x2ec   : > { %v1332_v35 = vpack.c.bf16 %v1326_v32, %v1325_v31 }
 0x2ed   : > { %v3668_v36 = vpack.c.bf16 %v1324_v34, %v1323_v33  ;;  %v2554_v37 = vpop.f32.mrb[8].mxu0 }
 0x2ee   : > { %v1321_v38 = vadd.f32 %v2554_v37, %v2342_v3  ;;  %v1293_v39 = vpop.f32.mrb[9].mxu0 }
 0x2ef   : > { %v1319_v40 = vadd.f32 %v2342_v3, %v1293_v39  ;;  %v2555_v41 = vpop.f32.mrb[10].mxu0  ;;  %2557 = vmatpush3.bf16.msra.mxu1 %v3668_v36 }
 0x2f0   : > { %v1322_v42 = vadd.f32 %v2555_v41, %v2342_v3  ;;  %v1296_v43 = vpop.f32.mrb[11].mxu0  ;;  %2558 = vmatprep.subr.bf16.mxu1 %v3171_v24  ;;  %v1329_v45 = vmax.f32 %v1321_v38, 0.0 }
 0x2f1   : > { %v1320_v44 = vadd.f32 %v2342_v3, %v1296_v43  ;;  %v1327_v48 = vmax.f32 %v1319_v40, 0.0  ;;  %v2831_v3 = vld [vmem:[#allocation7 + $0x30] sm:$0xff]  }
 0x2f2   : > { %v1330_v46 = vmax.f32 %v1322_v42, 0.0 }
 0x2f3   : > { %v1328_v49 = vmax.f32 %v1320_v44, 0.0  ;;  %2559 = vmatpush3.bf16.msra.mxu1 %v1332_v35 }
 0x2f4   : > { %v1334_v50 = vpack.c.bf16 %v1330_v46, %v1329_v45  ;;  %2564 = vmatprep.subr.bf16.mxu1 %v3171_v24  ;;  %v1715_v45 = vld [vmem:[%s3568_s14] sm:$0xf]  ;;  %v1716_v46 = vld [vmem:[%s3568_s14 + $0x4] sm:$0xf] }
 0x2f5   : > { %v3674_v51 = vpack.c.bf16 %v1328_v49, %v1327_v48  ;;  %v2834_v48 = vld [vmem:[#allocation8 + $0x8] sm:$0xff]   ;;  %v2835_v49 = vld [vmem:[#allocation8 + $0x10] sm:$0xff]  }
 0x2f6   : > { %2561 = vmatmul.mubr.msk.bf16.vlgmr.msra.gmra.mrb[4].mxu1 %vm1384_vm2, %v2815_v47  ;;  %v2833_v47 = vld [vmem:[#allocation8] sm:$0xff]  }
 0x2f7   : > { %2565 = vmatpush3.bf16.msra.mxu1 %v3674_v51  ;;  %2568 = vmatprep.mubr.msk.bf16.mxu1 %vm3172_vm1, %v3171_v24 }
 0x2f8   : > { %2566 = vmatprep.subr.bf16.mxu1 %v3171_v24 }
 0x2fb   : > { %2567 = vmatpush3.bf16.msra.mxu1 %v1334_v50  ;;  %v2836_v50 = vld [vmem:[#allocation8 + $0x18] sm:$0xff]  }
 0x2fc   : > { %2572 = vmatprep.subr.bf16.mxu1 %v2817_v52 }
 0x2fe   : > { %2569 = vmatmul.mubr.msk.bf16.vlgmr.msra.gmra.mrb[8].mxu1 %vm1384_vm2, %v2816_v53  ;;  %v2839_v53 = vld [vmem:[#allocation8 + $0x30] sm:$0xff]  }
 0x2ff   : > { %2573 = vmatpush3.bf16.msra.mxu1 %v2817_v52  ;;  %v2838_v52 = vld [vmem:[#allocation8 + $0x28] sm:$0xff]  }
 0x300   : > { %2574 = vmatprep.subr.bf16.mxu1 %v2818_v54 }
 0x303   : > { %2575 = vmatpush3.bf16.msra.mxu1 %v2818_v54  ;;  %v2840_v54 = vld [vmem:[#allocation8 + $0x38] sm:$0xff]  }
 0x304   : > { %2576 = vmatprep.subr.bf16.mxu1 %v2819_v55 }
 0x307   : > { %2577 = vmatpush3.bf16.msra.mxu1 %v2819_v55  ;;  %v2846_v55 = vld [vmem:[#allocation13 + $0x28] sm:$0xff]  }
 0x308   : > { %2578 = vmatprep.subr.bf16.mxu1 %v2820_v56 }
 0x30b   : > { %2579 = vmatpush3.bf16.msra.mxu1 %v2820_v56  ;;  %v2847_v56 = vld [vmem:[#allocation13 + $0x30] sm:$0xff]  }
 0x30c   : > { %2580 = vmatprep.subr.bf16.mxu1 %v2821_v57 }
 0x30f   : > { %2581 = vmatpush3.bf16.msra.mxu1 %v2821_v57  ;;  %v2848_v57 = vld [vmem:[#allocation13 + $0x38] sm:$0xff]  }
 0x310   : > { %2582 = vmatprep.subr.bf16.mxu1 %v2822_v58 }
 0x313   : > { %2583 = vmatpush3.bf16.msra.mxu1 %v2822_v58 }
 0x314   : > { %2584 = vmatprep.subr.bf16.mxu1 %v2823_v59 }
 0x317   : > { %2585 = vmatpush3.bf16.msra.mxu1 %v2823_v59 }
 0x318   : > { %2586 = vmatprep.subr.bf16.mxu1 %v2824_v60 }
 0x31b   : > { %2587 = vmatpush3.bf16.msra.mxu1 %v2824_v60 }
 0x31c   : > { %2592 = vmatprep.subr.bf16.mxu1 %v2825_v61 }
 0x3c9   : > { %v1422_v62 = vpop.f32.mrb[4].mxu1 }
 0x3ca   : > { %v2562_v0 = vpop.f32.mrb[5].mxu1  ;;  %v1498_v7 = vmul.f32 %v1481_v63, %v1422_v62  ;;  %v1843_v62 = vpop.permute.xlu0 %1842 }
 0x3cb   : > { %v1425_v6 = vpop.f32.mrb[6].mxu1  ;;  %v1848_v63 = vpop.permute.xlu1 %1847 }
 0x3cc   : > { %v1499_v8 = vmul.f32 %v1486_v5, %v1425_v6  ;;  %v2563_v9 = vpop.f32.mrb[7].mxu1 }
 0x3ce   : > { %v1502_v10 = vpack.c.bf16 %v1499_v8, %v1498_v7 }
 0x3d0   : > { %2588 = vmatprep.mubr.bf16.mxu1 %v1502_v10 }
 0x3d1   : > { %v1471_v11 = vpop.f32.mrb[8].mxu1 }
 0x3d2   : > { %v2570_v13 = vpop.f32.mrb[9].mxu1  ;;  %v1500_v16 = vmul.f32 %v1491_v12, %v1471_v11 }
 0x3d3   : > { %v1474_v15 = vpop.f32.mrb[10].mxu1 }
 0x3d4   : > { %v1501_v17 = vmul.f32 %v1496_v14, %v1474_v15  ;;  %v2571_v18 = vpop.f32.mrb[11].mxu1  ;;  %v2384_v15 = vld [vmem:[%s3836_s26] ss:$0 sm:$0xff] }
 0x3d6   : > { %v1503_v19 = vpack.c.bf16 %v1501_v17, %v1500_v16 }
 0x3d8   : > { %2589 = vmatmul.mubr.bf16.vlgmr.msra.gmra.mrb[12].mxu1 %v1503_v19 }
 0x3d9   : > { %2593 = vmatpush3.bf16.msra.mxu1 %v2825_v61  ;;  %2608 = vmatprep.mubr.bf16.mxu1 %v3668_v36 }
 0x3da   : > { %2594 = vmatprep.subr.bf16.mxu1 %v2826_v20 }
 0x3dd   : > { %2595 = vmatpush3.bf16.msra.mxu1 %v2826_v20 }
 0x3de   : > { %2596 = vmatprep.subr.bf16.mxu1 %v2827_v21 }
 0x3e1   : > { %2597 = vmatpush3.bf16.msra.mxu1 %v2827_v21 }
 0x3e2   : > { %2598 = vmatprep.subr.bf16.mxu1 %v2828_v22 }
 0x3e5   : > { %2599 = vmatpush3.bf16.msra.mxu1 %v2828_v22 }
 0x3e6   : > { %2600 = vmatprep.subr.bf16.mxu1 %v2829_v23 }
 0x3e9   : > { %2601 = vmatpush3.bf16.msra.mxu1 %v2829_v23 }
 0x3ea   : > { %2602 = vmatprep.subr.bf16.mxu1 %v2830_v1 }
 0x3ed   : > { %2603 = vmatpush3.bf16.msra.mxu1 %v2830_v1 }
 0x3ee   : > { %2604 = vmatprep.subr.bf16.mxu1 %v2831_v3 }
 0x3f1   : > { %2605 = vmatpush3.bf16.msra.mxu1 %v2831_v3 }
 0x3f2   : > { %2606 = vmatprep.subr.bf16.mxu1 %v2832_v25 }
 0x3f5   : > { %2607 = vmatpush3.bf16.msra.mxu1 %v2832_v25 }
 0x3f6   : > { %2624 = vmatprep.subr.bf16.mxu1 %v3171_v24 }
 0x3f8   : > { %2609 = vmatmul.mubr.bf16.vlgmr.msra.gmra.mrb[12].mxu1 %v3674_v51  ;;  %v2837_v51 = vld [vmem:[#allocation8 + $0x20] sm:$0xff]  }
 0x3f9   : > { %2640 = vmatprep.mubr.msk.bf16.mxu1 %vm3172_vm1, %v3171_v24  ;;  %2625 = vmatpush3.bf16.msra.mxu1 %v2841_v2 }
 0x3fa   : > { %2626 = vmatprep.subr.bf16.mxu1 %v3171_v24 }
 0x3fd   : > { %2627 = vmatpush3.bf16.msra.mxu1 %v2842_v26 }
 0x3fe   : > { %2628 = vmatprep.subr.bf16.mxu1 %v3171_v24 }
 0x401   : > { %2629 = vmatpush3.bf16.msra.mxu1 %v2843_v4 }
 0x402   : > { %2630 = vmatprep.subr.bf16.mxu1 %v3171_v24 }
 0x405   : > { %2631 = vmatpush3.bf16.msra.mxu1 %v2844_v27 }
 0x406   : > { %2632 = vmatprep.subr.bf16.mxu1 %v3171_v24 }
 0x409   : > { %2633 = vmatpush3.bf16.msra.mxu1 %v2845_v28 }
 0x40a   : > { %2634 = vmatprep.subr.bf16.mxu1 %v3171_v24 }
 0x40d   : > { %2635 = vmatpush3.bf16.msra.mxu1 %v2846_v55 }
 0x40e   : > { %2636 = vmatprep.subr.bf16.mxu1 %v3171_v24 }
 0x411   : > { %2637 = vmatpush3.bf16.msra.mxu1 %v2847_v56 }
 0x412   : > { %2638 = vmatprep.subr.bf16.mxu1 %v3171_v24 }
 0x415   : > { %2639 = vmatpush3.bf16.msra.mxu1 %v2848_v57 }
 0x4cb   : > { %v2610_v30 = vpop.f32.mrb[12].mxu1 }
 0x4cc   : > { %v1707_v31 = vadd.f32 %v2610_v30, %v2363_v29  ;;  %v1683_v32 = vpop.f32.mrb[13].mxu1 }
 0x4cd   : > { %v1705_v33 = vadd.f32 %v2363_v29, %v1683_v32  ;;  %v2611_v34 = vpop.f32.mrb[14].mxu1 }
 0x4ce   : > { %v1711_v35 = vmax.f32 %v1707_v31, 0.0  ;;  %v1708_v36 = vadd.f32 %v2611_v34, %v2363_v29  ;;  %v1686_v37 = vpop.f32.mrb[15].mxu1 }
 0x4cf   : > { %v1709_v38 = vmax.f32 %v1705_v33, 0.0  ;;  %v1706_v39 = vadd.f32 %v2363_v29, %v1686_v37 }
 0x4d0   : > { %v1712_v40 = vmax.f32 %v1708_v36, 0.0 }
 0x4d1   : > { %v2398_v41 = vpack.c.bf16 %v1711_v35, %v1709_v38  ;;  %v1710_v42 = vmax.f32 %v1706_v39, 0.0 }
 0x4d2   : > { %v1714_v43 = vpack.c.bf16 %v1712_v40, %v1711_v35 }
 0x4d3   : > { %v1713_v44 = vpack.c.bf16 %v1710_v42, %v1709_v38 }
 0x4d5   : > { %2613 = vmatpush3.bf16.msra.mxu0 %v1713_v44 }
 0x4d6   : > { %2618 = vmatprep.subr.bf16.mxu0 %v3171_v24 }
 0x4d8   : > { %2615 = vmatmul.mubr.msk.bf16.vlgmr.msra.gmra.mrb[12].mxu0 %vm1753_vm3, %v1715_v45 }
 0x4d9   : > { %2619 = vmatpush3.bf16.msra.mxu0 %v1714_v43  ;;  %2620 = vmatprep.mubr.msk.bf16.mxu0 %vm3172_vm1, %v3171_v24 }
 0x4da   : > { %2644 = vmatprep.subr.bf16.mxu0 %v3171_v24 }
 0x4e0   : > { %2621 = vmatmul.mubr.msk.bf16.vlgmr.msra.gmra.mrb[16].mxu0 %vm1753_vm3, %v1716_v46 }
 0x4e1   : > { %2645 = vmatpush3.bf16.msra.mxu0 %v2833_v47  ;;  %2660 = vmatprep.mubr.msk.bf16.mxu0 %vm3172_vm1, %v3171_v24 }
 0x4e2   : > { %2646 = vmatprep.subr.bf16.mxu0 %v3171_v24 }
 0x4e5   : > { %2647 = vmatpush3.bf16.msra.mxu0 %v2834_v48 }
 0x4e6   : > { %2648 = vmatprep.subr.bf16.mxu0 %v3171_v24 }
 0x4e9   : > { %2649 = vmatpush3.bf16.msra.mxu0 %v2835_v49 }
 0x4ea   : > { %2650 = vmatprep.subr.bf16.mxu0 %v3171_v24 }
 0x4ed   : > { %2651 = vmatpush3.bf16.msra.mxu0 %v2836_v50 }
 0x4ee   : > { %2652 = vmatprep.subr.bf16.mxu0 %v3171_v24 }
 0x4f1   : > { %2653 = vmatpush3.bf16.msra.mxu0 %v2837_v51 }
 0x4f2   : > { %2654 = vmatprep.subr.bf16.mxu0 %v3171_v24 }
 0x4f5   : > { %2655 = vmatpush3.bf16.msra.mxu0 %v2838_v52 }
 0x4f6   : > { %2656 = vmatprep.subr.bf16.mxu0 %v3171_v24 }
 0x4f9   : > { %2657 = vmatpush3.bf16.msra.mxu0 %v2839_v53 }
 0x4fa   : > { %2658 = vmatprep.subr.bf16.mxu0 %v3171_v24 }
 0x4fd   : > { %2659 = vmatpush3.bf16.msra.mxu0 %v2840_v54 }
 0x500   : > { %2661 = vmatmul.mubr.bf16.vlgmr.msra.gmra.mrb[20].mxu0 %v2398_v41 }
 0x5ab   : > { %v1791_v58 = vpop.f32.mrb[12].mxu0 }
 0x5ac   : > { %v2616_v59 = vpop.f32.mrb[13].mxu0  ;;  %v1850_v5 = vmul.f32 %v1843_v62, %v1791_v58 }
 0x5ad   : > { %v1794_v60 = vpop.f32.mrb[14].mxu0 }
 0x5ae   : > { %v2617_v61 = vpop.f32.mrb[15].mxu0 }
 0x5b3   : > { %v1834_v0 = vpop.f32.mrb[16].mxu0 }
 0x5b4   : > { %v1851_v6 = vmul.f32 %v1848_v63, %v1834_v0  ;;  %v2622_v7 = vpop.f32.mrb[17].mxu0 }
 0x5b5   : > { %v1837_v8 = vpop.f32.mrb[18].mxu0 }
 0x5b6   : > { %v2397_v9 = vpack.c.bf16 %v1851_v6, %v1850_v5  ;;  %v2623_v10 = vpop.f32.mrb[19].mxu0 }
 0x5b8   : > { %2641 = vmatmul.mubr.bf16.vlgmr.msra.gmra.mrb[16].mxu1 %v2397_v9 }
 0x5d3   : > { %v2037_v11 = vpop.f32.mrb[20].mxu0 }
 0x5d4   : > { %v2662_v24 = vpop.f32.mrb[21].mxu0 }
 0x5d5   : > { %v2040_v12 = vpop.f32.mrb[22].mxu0 }
 0x5d6   : > { %v2663_v13 = vpop.f32.mrb[23].mxu0 }
 0x68b   : > { %v1942_v14 = vpop.f32.mrb[16].mxu1 }
 0x68c   : > { %v2038_v16 = vadd.f32 %v2037_v11, %v1942_v14  ;;  %v2642_v17 = vpop.f32.mrb[17].mxu1 }
 0x68d   : > { %v1945_v18 = vpop.f32.mrb[18].mxu1 }
 0x68e   : > { %v2051_v19 = vadd.f32 %v2384_v15, %v2038_v16  ;;  %v2041_v20 = vadd.f32 %v2040_v12, %v1945_v18  ;;  %v2643_v21 = vpop.f32.mrb[19].mxu1 }
 0x690   : > { %2053 = vst [vmem:[%s740_s20] sm:$0xff] %v2051_v19  ;;  %v2052_v22 = vadd.f32 %v2384_v15, %v2041_v20 }
 0x692   : > { %2054 = vst [vmem:[%s740_s20 + $0x8] sm:$0xff] %v2052_v22 }
 0x693   : > { %3090 = shalt.err (!%p3087_p11)
}
 0x694   : > { %s3091_s8 = scalar_lea.hbm %s3722_s10, 256  ;;  %s3095_s14 = scalar_lea.hbm %s3837_s19, 512 }
 0x695   : > { %p3092_p3 = scmp.ne.s32.totalorder %s3722_s10, %s3091_s8  ;;  %p3096_p13 = scmp.lt.u32.totalorder %s3722_s10, %s3837_s19 }
 0x696   : > { %p3097_p0 = scmp.lt.u32.totalorder %s3095_s14, %s3091_s8  ;;  %p3099_p2 = scmp.lt.u32.totalorder %s3091_s8, %s3722_s10 }
 0x697   : > { %p3093_p12 = pnand %p3092_p3, %p3838_p6 }
 0x698   : > { %p3098_p7 = por %p3097_p0, %p3096_p13 }
 0x699   : > { %p3094_p1 = pneg %p3093_p12 }
 0x69a   : > { %p3100_p10 = por %p3099_p2, %p3098_p7 }
 0x69c   : > { %p3101_p5 = pnand %p3100_p10, %p3094_p1 }
 0x69e   : > { %3104 = shalt.err (!%p3101_p5)
}
 0x69f   : > { %s3174_s20 = smov 128   ;;  %s3175_s0 = smov 8  }
 0x6a0   : > { %2700 = dma.vmem_to_hbm [thread:$0]  (%p3838_p6), %s3717_s7, 256, %s3722_s10, %s2056_s15, %s3174_s20, %s3174_s20, %s3175_s0  }
 0x6a1 PF: > { %s2084_s17 = sand.u32 1, %s3147_s21   ;;  %p3839_p9 = scmp.ne.s32.totalorder %s3817_s25, 0 }
 0x6a2   : > { %p3840_p4 = scmp.ge.s32.totalorder %s3159_s24, 2  ;;  %s2085_s1 = scalar_lea.sflag [#allocation4], %s2084_s17 }
 0x6a4   : > { %p2726_p8 = pnand %p3840_p4, %p3839_p9 }
 0x6a6   : > { %3142 = dma.done.wait (!%p2726_p8), %s2085_s1, 256  }
 0x6a7   : > { %3144 = vsyncadd (!%p2726_p8), %s2085_s1, 4294967040  ;;  %p34_p11 = scmp.ge.s32.totalorder %s3434_s29, 4   ;;  %s3841_s21 = smov %s3151_s22 }
 0x6a8   : > { %s3842_s22 = smov %s3155_s23  ;;  %s3843_s23 = smov %s3446_s5 }
 0x6a9   : > { %s3844_s24 = smov %s3434_s29  ;;  %36 = sbr.rel (!%p34_p11) target bundleno = 24 (0x18), region = 177 }
 0x6b0   :  { %2090 = vsyncpa [#allocation3], 1 }
 0x6b1   :  { %2092 = vsyncpa [#allocation3 + $0x1], 1 }
 0x6b2   :  { %2093 = vsyncpa [#allocation6], 1 }
 0x6b3   :  { %2095 = vsyncpa [#allocation6 + $0x1], 1 }
 0x6b4   :  { %2096 = vsyncpa [#allocation9], 1 }
 0x6b5   :  { %2097 = vsyncpa [#allocation12], 1 }
 0x6b6   :  { %2098 = vsyncpa [#allocation4], 1 }
 0x6b7   :  { %2100 = vsyncpa [#allocation4 + $0x1], 1 }

</bundles_post_ra>
